<compile_context>
chip_gen: v7x
topology: tpu7x:2x2x1
jax: 0.10.0
libtpu: 0.0.40
codegen_flags: <defaults>
</compile_context>

<pallas_src>
import functools
import math

import jax
import jax.numpy as jnp
from jax.experimental import pallas as pl
from jax.experimental.pallas import tpu as pltpu

_EPS = 1e-8          # nn.InstanceNorm2d(..., eps=1e-08) in the module
_SLOPE = 0.2         # nn.LeakyReLU(0.2)


# ------------------------- weight packing (eager, outside jit) ------------------------
def _phase_select():
    # S[d, p, k] = 1 iff ConvTranspose tap k contributes to output phase p from
    # padded-input patch offset d (k = 3 + p - 2d, valid when 0 <= d - p <= 1).
    tbl = [[[1.0 if (0 <= d - p <= 1 and k == 3 + p - 2 * d) else 0.0
             for k in range(4)] for p in range(2)] for d in range(3)]
    return jnp.array(tbl, jnp.float32)


def _phase_weight(wconv):
    """(Cin, Cout, 4, 4) ConvTranspose2d weight -> (9, Cin, 4*Cout) per-patch-offset
    weights; output columns ordered (phase = 2*py + px, cout)."""
    cin, cout = int(wconv.shape[0]), int(wconv.shape[1])
    s = _phase_select()
    w6 = jnp.einsum('iokl,dpk,eql->deipqo', wconv, s, s)   # (3,3,Cin,2,2,Cout)
    return w6.reshape(9, cin, 4 * cout)


def prepare_params(ws):
    """Pack PyTorch-layout weights once (hoisted out of the jitted forward)."""
    w0 = ws[0]
    cin0, c0 = int(w0.shape[0]), int(w0.shape[1])
    return {
        # layer0 (k4 s1 p0 on a 1x1 input): rows ordered (ky*4 + kx)*Cin + k
        'w0exp': jnp.transpose(w0, (2, 3, 0, 1)).reshape(16 * cin0, c0),
        'w_up': [_phase_weight(w) for w in ws[1:-1]],
        # final layer is consumed transposed (lane-dense output): (9, 4*Cout, Cin)
        'w_fin': jnp.transpose(_phase_weight(ws[-1]), (0, 2, 1)),
    }


# ------------------------------- in-kernel building blocks ----------------------------
def _shift_rows(x, s):
    """y[r, :] = x[r + s, :] where in range, zeros elsewhere (s: static Python int)."""
    if s == 0:
        return x
    m = x.shape[0]
    pad = jnp.zeros((abs(s), x.shape[1]), x.dtype)
    if s > 0:
        return jnp.concatenate([x[s:, :], pad], axis=0)
    return jnp.concatenate([pad, x[:m + s, :]], axis=0)


def _shift_cols(x, s):
    """y[:, r] = x[:, r + s] where in range, zeros elsewhere (s: static Python int)."""
    if s == 0:
        return x
    m = x.shape[1]
    pad = jnp.zeros((x.shape[0], abs(s)), x.dtype)
    if s > 0:
        return jnp.concatenate([x[:, s:], pad], axis=1)
    return jnp.concatenate([pad, x[:, :m + s]], axis=1)


def _spatial_coords(idx, h, w):
    """Flattened (sample, y, x) index -> (y*w + x, x); bit ops for power-of-two dims."""
    hw = h * w
    if (hw & (hw - 1)) == 0 and (w & (w - 1)) == 0:
        r_in = jnp.bitwise_and(idx, hw - 1)
        x_in = jnp.bitwise_and(idx, w - 1)
    else:
        r_in = idx % hw
        x_in = idx % w
    return r_in, x_in


def _boundary_conds(dy, dx, r_in, x_in, h, w):
    conds = []
    if dy == 0:
        conds.append(r_in >= w)                 # y >= 1
    elif dy == 2:
        conds.append(r_in < (h - 1) * w)        # y < h - 1
    if dx == 0:
        conds.append(x_in >= 1)
    elif dx == 2:
        conds.append(x_in < w - 1)
    return conds


def _conv_phase_rows(x, w9, h, w):
    """Phase-decomposed ConvTranspose2d(k4, s2, p1) as 9 shift+mask matmuls.

    x:  (N*h*w, Cin) f32, rows = (sample, y, x) over the input grid (no padding).
    w9: (9, Cin, 4*Cout) per-patch-offset weights.
    Returns (N*h*w, 4*Cout) f32 in phase form (lanes = (2*py + px, cout))."""
    m = x.shape[0]
    cout4 = w9.shape[2]
    row = jax.lax.broadcasted_iota(jnp.int32, (m, 1), 0)
    r_in, x_in = _spatial_coords(row, h, w)
    acc = jnp.zeros((m, cout4), jnp.float32)
    for dy in range(3):
        for dx in range(3):
            shift = (dy - 1) * w + (dx - 1)
            t = _shift_rows(x, shift)
            conds = _boundary_conds(dy, dx, r_in, x_in, h, w)
            if conds:
                valid = functools.reduce(jnp.logical_and, conds)
                t = jnp.where(valid, t, 0.0)
            acc = acc + jnp.dot(t, w9[dy * 3 + dx],
                                preferred_element_type=jnp.float32)
    return acc


def _instnorm_lrelu_rows(x, n, rows_per):
    """InstanceNorm + LeakyReLU on a rows-spatial activation (N*rows_per, C)."""
    inv_cnt = 1.0 / float(rows_per)
    parts = []
    for b in range(n):
        xb = x[b * rows_per:(b + 1) * rows_per, :]
        mean = jnp.sum(xb, axis=0, keepdims=True) * inv_cnt
        xc = xb - mean
        var = jnp.sum(xc * xc, axis=0, keepdims=True) * inv_cnt
        yb = xc * jax.lax.rsqrt(var + _EPS)
        parts.append(jnp.where(yb > 0.0, yb, _SLOPE * yb))
    return jnp.concatenate(parts, axis=0) if n > 1 else parts[0]


def _instnorm_lrelu_phase(x, n, rows_per, cout):
    """InstanceNorm + LeakyReLU on a phase-form activation (N*rows_per, 4*cout).
    Stats are per sample / per channel over rows_per * 4 spatial positions; the
    normalization is applied full-width (single lane-dense expression)."""
    inv_cnt = 1.0 / (4.0 * rows_per)
    parts = []
    for b in range(n):
        xb = x[b * rows_per:(b + 1) * rows_per, :]
        rs = jnp.sum(xb, axis=0, keepdims=True)                      # (1, 4*cout)
        mean_c = (rs[:, 0:cout] + rs[:, cout:2 * cout]
                  + rs[:, 2 * cout:3 * cout] + rs[:, 3 * cout:4 * cout]) * inv_cnt
        mean_f = jnp.concatenate([mean_c] * 4, axis=1)               # (1, 4*cout)
        xc = xb - mean_f
        ss = jnp.sum(xc * xc, axis=0, keepdims=True)
        var_c = (ss[:, 0:cout] + ss[:, cout:2 * cout]
                 + ss[:, 2 * cout:3 * cout] + ss[:, 3 * cout:4 * cout]) * inv_cnt
        inv_f = jnp.concatenate([jax.lax.rsqrt(var_c + _EPS)] * 4, axis=1)
        yb = xc * inv_f
        parts.append(jnp.where(yb > 0.0, yb, _SLOPE * yb))
    return jnp.concatenate(parts, axis=0) if n > 1 else parts[0]


# --------------------------------------- kernels --------------------------------------
def _make_first_kernel(n):
    """Fused: layer0 (1x1 ConvT k4 s1 p0) + IN + LReLU + first up-layer + IN + LReLU."""
    h = w = 4

    def kernel(zexp_ref, w0_ref, w1_ref, o_ref):
        # layer 0 as a single spatial-rows matmul: rows = (sample, ky, kx)
        h0 = jnp.dot(zexp_ref[...], w0_ref[...], preferred_element_type=jnp.float32)
        h0 = _instnorm_lrelu_rows(h0, n, 16)
        # first up layer: in-VMEM im2col (shift + mask) feeding 9 MXU matmuls
        w9 = w1_ref[...]
        cout = w9.shape[2] // 4
        acc = _conv_phase_rows(h0, w9, h, w)
        y = _instnorm_lrelu_phase(acc, n, h * w, cout)
        o_ref[...] = y.astype(o_ref.dtype)       # single full-width (bf16) store

    return kernel


def _make_up_kernel(n, h, w):
    """Generic middle up-layer: ConvT(k4 s2 p1) + InstanceNorm + LeakyReLU."""
    rows_per = h * w

    def kernel(x_ref, wp_ref, o_ref):
        x = x_ref[...].astype(jnp.float32)
        w9 = wp_ref[...]
        cout = w9.shape[2] // 4
        acc = _conv_phase_rows(x, w9, h, w)
        y = _instnorm_lrelu_phase(acc, n, rows_per, cout)
        o_ref[...] = y.astype(o_ref.dtype)

    return kernel


def _make_final_kernel(n, h, w):
    """Final ConvT(k4 s2 p1) + Tanh, computed transposed so the store is lane-dense:
    input (Cin, N*h*w), output (4*Cout, N*h*w)."""
    m = n * h * w

    def kernel(xt_ref, wt_ref, o_ref):
        xt = xt_ref[...].astype(jnp.float32)     # (Cin, m), cols = (sample, y, x)
        wt = wt_ref[...]                         # (9, 4*Cout, Cin)
        col = jax.lax.broadcasted_iota(jnp.int32, (1, m), 1)
        r_in, x_in = _spatial_coords(col, h, w)
        acc = jnp.zeros((wt.shape[1], m), jnp.float32)
        for dy in range(3):
            for dx in range(3):
                shift = (dy - 1) * w + (dx - 1)
                t = _shift_cols(xt, shift)
                conds = _boundary_conds(dy, dx, r_in, x_in, h, w)
                if conds:
                    valid = functools.reduce(jnp.logical_and, conds)
                    t = jnp.where(valid, t, 0.0)
                acc = acc + jnp.dot(wt[dy * 3 + dx], t,
                                    preferred_element_type=jnp.float32)
        o_ref[...] = jnp.tanh(acc)               # lane-dense f32 store

    return kernel


# ------------------------------------ forward pass ------------------------------------
def _up_call(x, wp, n, h, w):
    cin = int(wp.shape[1])
    cout = int(wp.shape[2]) // 4
    m = n * h * w
    return pl.pallas_call(
        _make_up_kernel(n, h, w),
        out_shape=jax.ShapeDtypeStruct((m, 4 * cout), jnp.bfloat16),
        grid=(1,),
        in_specs=[pl.BlockSpec((m, cin), lambda i: (0, 0)),
                  pl.BlockSpec((9, cin, 4 * cout), lambda i: (0, 0, 0))],
        out_specs=pl.BlockSpec((m, 4 * cout), lambda i: (0, 0)),
        compiler_params=pltpu.CompilerParams(dimension_semantics=("arbitrary",)),
    )(x, wp)


def g_forward(z_nchw, packed):
    """z: (N, input_dim, 1, 1) -> (N, output_dim, image_size, image_size), NCHW."""
    n, cin = int(z_nchw.shape[0]), int(z_nchw.shape[1])
    z2 = z_nchw.reshape(n, cin)
    w0exp, w_up, w_fin = packed['w0exp'], packed['w_up'], packed['w_fin']
    assert len(w_up) >= 1, "image_size must be >= 16 (at least one upsampling block)"

    c0 = int(w0exp.shape[1])
    c1 = int(w_up[0].shape[2]) // 4

    # Expand z so layer0 becomes one spatial-rows matmul: zexp[(b,s), s*Cin + k] = z[b,k]
    eye16 = jnp.eye(16, dtype=z2.dtype)
    zexp = (eye16[None, :, :, None] * z2[:, None, None, :]).reshape(n * 16, 16 * cin)

    # Fused layer0 + first up-layer (2 pallas_calls total for the default config).
    x = pl.pallas_call(
        _make_first_kernel(n),
        out_shape=jax.ShapeDtypeStruct((n * 16, 4 * c1), jnp.bfloat16),
        grid=(1,),
        in_specs=[pl.BlockSpec((n * 16, 16 * cin), lambda i: (0, 0)),
                  pl.BlockSpec((16 * cin, c0), lambda i: (0, 0)),
                  pl.BlockSpec((9, c0, 4 * c1), lambda i: (0, 0, 0))],
        out_specs=pl.BlockSpec((n * 16, 4 * c1), lambda i: (0, 0)),
        compiler_params=pltpu.CompilerParams(dimension_semantics=("arbitrary",)),
    )(zexp, w0exp, w_up[0])

    h = w = 4              # coarse grid of the phase-form activation `x`
    c = c1
    for wp in w_up[1:]:
        # depth-to-space (tiny bf16 permute in XLA): phase form -> rows-spatial
        x = (x.reshape(n, h, w, 2, 2, c)
               .transpose(0, 1, 3, 2, 4, 5)
               .reshape(n * 4 * h * w, c))
        h, w = 2 * h, 2 * w
        x = _up_call(x, wp, n, h, w)
        c = int(wp.shape[2]) // 4

    # Final layer (Tanh): feed channels-first transposed so the output slab is
    # lane-dense ((4*Cout) x (N*H*W)) instead of a 12-lane masked store.
    xt = (x.reshape(n, h, w, 2, 2, c)
            .transpose(5, 0, 1, 3, 2, 4)
            .reshape(c, n * 4 * h * w))
    h, w = 2 * h, 2 * w
    cout = int(w_fin.shape[1]) // 4
    m = n * h * w
    out_t = pl.pallas_call(
        _make_final_kernel(n, h, w),
        out_shape=jax.ShapeDtypeStruct((4 * cout, m), jnp.float32),
        grid=(1,),
        in_specs=[pl.BlockSpec((c, m), lambda i: (0, 0)),
                  pl.BlockSpec((9, 4 * cout, c), lambda i: (0, 0, 0))],
        out_specs=pl.BlockSpec((4 * cout, m), lambda i: (0, 0)),
        compiler_params=pltpu.CompilerParams(dimension_semantics=("arbitrary",)),
    )(xt, w_fin)

    # rows = (py, px, cout), cols = (n, y, x)  ->  NCHW (N, Cout, 2h, 2w)
    out = (out_t.reshape(2, 2, cout, n, h, w)
                .transpose(3, 2, 4, 0, 5, 1)
                .reshape(n, cout, 2 * h, 2 * w))
    return out


# ------------------------------------ Generator G -------------------------------------
def init_g_params(key, input_dim, output_dim, image_size, Gscale, hidden_scale):
    """Deterministic synthetic weights, shapes matching G.__init__ (bias=False)."""
    up_times = int(math.log(image_size, 2) - 3)
    first_hidden = image_size * Gscale
    # TODO(synk): elr=True uses ln.ConvTranspose2d (equalized-LR runtime weight scaling);
    # that per-layer fan-in scale constant is folded into this deterministic init.
    ws = []
    k, key = jax.random.split(key)
    ws.append(0.05 * jax.random.normal(k, (input_dim, first_hidden, 4, 4), jnp.float32))
    hidden = first_hidden
    for _ in range(up_times):
        k, key = jax.random.split(key)
        ws.append(0.05 * jax.random.normal(
            k, (hidden, int(hidden / hidden_scale), 4, 4), jnp.float32))
        hidden //= 2
    k, key = jax.random.split(key)
    ws.append(0.05 * jax.random.normal(k, (hidden, output_dim, 4, 4), jnp.float32))
    return ws


if __name__ == "__main__":
    key = jax.random.PRNGKey(0)
    kz, kp = jax.random.split(key)

    # Small config consistent with the module: image_size=16, Gscale=2
    # -> first_hidden_dim=32, one upsampling block; z is (N, input_dim, 1, 1).
    batch, input_dim, output_dim, image_size, Gscale, hidden_scale = 2, 16, 3, 16, 2, 2

    z = jax.random.normal(kz, (batch, input_dim, 1, 1), jnp.float32)
    ws = init_g_params(kp, input_dim, output_dim, image_size, Gscale, hidden_scale)
    packed = prepare_params(ws)     # weight packing hoisted out of the jitted forward

    out = jax.jit(g_forward)(z, packed)
    out = jax.block_until_ready(out)

    assert out.shape == (batch, output_dim, image_size, image_size), out.shape
    assert bool(jnp.all(jnp.isfinite(out)))
    print("KERNEL_OK")
</pallas_src>

<mosaic_0001>
module attributes {stable_mosaic.version = 11 : i64} {
  func.func @kernel(%arg0: i32, %arg1: memref<32x256xf32, #tpu.memory_space<vmem>>, %arg2: memref<256x32xf32, #tpu.memory_space<vmem>>, %arg3: memref<9x32x64xf32, #tpu.memory_space<vmem>>, %arg4: memref<32x64xbf16, #tpu.memory_space<vmem>>) attributes {dimension_semantics = [#tpu.dimension_semantics<arbitrary>], iteration_bounds = array<i64: 1>, scalar_prefetch = 0 : i64, scratch_operands = 0 : i64, tpu.core_type = #tpu.core_type<tc>, window_params = [{pipeline_mode = #tpu.pipeline_mode<synchronous>, transform_indices = @transform_0, window_bounds = array<i64: 32, 256>}, {pipeline_mode = #tpu.pipeline_mode<synchronous>, transform_indices = @transform_1, window_bounds = array<i64: 256, 32>}, {pipeline_mode = #tpu.pipeline_mode<synchronous>, transform_indices = @transform_2, window_bounds = array<i64: 9, 32, 64>}, {pipeline_mode = #tpu.pipeline_mode<synchronous>, transform_indices = @transform_3, window_bounds = array<i64: 32, 64>}]} {
    %c0 = arith.constant 0 : index
    %c0_0 = arith.constant 0 : index
    %0 = vector.load %arg1[%c0, %c0_0] : memref<32x256xf32, #tpu.memory_space<vmem>>, vector<32x256xf32>
    %c0_1 = arith.constant 0 : index
    %c0_2 = arith.constant 0 : index
    %1 = vector.load %arg2[%c0_1, %c0_2] : memref<256x32xf32, #tpu.memory_space<vmem>>, vector<256x32xf32>
    %cst = arith.constant dense<0.000000e+00> : vector<32x32xf32>
    %2 = tpu.matmul %0, %1, %cst {dimension_numbers = #tpu.dot_dimension_numbers<[1], [0], [0], [1], [0, 0, 1, 1], [], []>} : vector<32x256xf32>, vector<256x32xf32>, vector<32x32xf32> -> vector<32x32xf32>
    %3 = vector.extract_strided_slice %2 {offsets = [0, 0], sizes = [16, 32], strides = [1, 1]} : vector<32x32xf32> to vector<16x32xf32>
    %cst_3 = arith.constant dense<0.000000e+00> : vector<32xf32>
    %4 = vector.multi_reduction <add>, %3, %cst_3 [0] : vector<16x32xf32> to vector<32xf32>
    %5 = vector.shape_cast %4 : vector<32xf32> to vector<1x32xf32>
    %cst_4 = arith.constant 6.250000e-02 : f32
    %6 = vector.broadcast %cst_4 : f32 to vector<1x32xf32>
    %7 = arith.mulf %5, %6 : vector<1x32xf32>
    %8 = vector.broadcast %7 : vector<1x32xf32> to vector<16x32xf32>
    %9 = arith.subf %3, %8 : vector<16x32xf32>
    %10 = arith.mulf %9, %9 : vector<16x32xf32>
    %cst_5 = arith.constant dense<0.000000e+00> : vector<32xf32>
    %11 = vector.multi_reduction <add>, %10, %cst_5 [0] : vector<16x32xf32> to vector<32xf32>
    %12 = vector.shape_cast %11 : vector<32xf32> to vector<1x32xf32>
    %cst_6 = arith.constant 6.250000e-02 : f32
    %13 = vector.broadcast %cst_6 : f32 to vector<1x32xf32>
    %14 = arith.mulf %12, %13 : vector<1x32xf32>
    %cst_7 = arith.constant 9.99999993E-9 : f32
    %15 = vector.broadcast %cst_7 : f32 to vector<1x32xf32>
    %16 = arith.addf %14, %15 : vector<1x32xf32>
    %17 = math.rsqrt %16 : vector<1x32xf32>
    %18 = vector.broadcast %17 : vector<1x32xf32> to vector<16x32xf32>
    %19 = arith.mulf %9, %18 : vector<16x32xf32>
    %cst_8 = arith.constant 0.000000e+00 : f32
    %20 = vector.broadcast %cst_8 : f32 to vector<16x32xf32>
    %21 = arith.cmpf ogt, %19, %20 : vector<16x32xf32>
    %cst_9 = arith.constant 2.000000e-01 : f32
    %22 = vector.broadcast %cst_9 : f32 to vector<16x32xf32>
    %23 = arith.mulf %22, %19 : vector<16x32xf32>
    %24 = arith.select %21, %19, %23 : vector<16x32xi1>, vector<16x32xf32>
    %25 = vector.extract_strided_slice %2 {offsets = [16, 0], sizes = [16, 32], strides = [1, 1]} : vector<32x32xf32> to vector<16x32xf32>
    %cst_10 = arith.constant dense<0.000000e+00> : vector<32xf32>
    %26 = vector.multi_reduction <add>, %25, %cst_10 [0] : vector<16x32xf32> to vector<32xf32>
    %27 = vector.shape_cast %26 : vector<32xf32> to vector<1x32xf32>
    %cst_11 = arith.constant 6.250000e-02 : f32
    %28 = vector.broadcast %cst_11 : f32 to vector<1x32xf32>
    %29 = arith.mulf %27, %28 : vector<1x32xf32>
    %30 = vector.broadcast %29 : vector<1x32xf32> to vector<16x32xf32>
    %31 = arith.subf %25, %30 : vector<16x32xf32>
    %32 = arith.mulf %31, %31 : vector<16x32xf32>
    %cst_12 = arith.constant dense<0.000000e+00> : vector<32xf32>
    %33 = vector.multi_reduction <add>, %32, %cst_12 [0] : vector<16x32xf32> to vector<32xf32>
    %34 = vector.shape_cast %33 : vector<32xf32> to vector<1x32xf32>
    %cst_13 = arith.constant 6.250000e-02 : f32
    %35 = vector.broadcast %cst_13 : f32 to vector<1x32xf32>
    %36 = arith.mulf %34, %35 : vector<1x32xf32>
    %cst_14 = arith.constant 9.99999993E-9 : f32
    %37 = vector.broadcast %cst_14 : f32 to vector<1x32xf32>
    %38 = arith.addf %36, %37 : vector<1x32xf32>
    %39 = math.rsqrt %38 : vector<1x32xf32>
    %40 = vector.broadcast %39 : vector<1x32xf32> to vector<16x32xf32>
    %41 = arith.mulf %31, %40 : vector<16x32xf32>
    %cst_15 = arith.constant 0.000000e+00 : f32
    %42 = vector.broadcast %cst_15 : f32 to vector<16x32xf32>
    %43 = arith.cmpf ogt, %41, %42 : vector<16x32xf32>
    %cst_16 = arith.constant 2.000000e-01 : f32
    %44 = vector.broadcast %cst_16 : f32 to vector<16x32xf32>
    %45 = arith.mulf %44, %41 : vector<16x32xf32>
    %46 = arith.select %43, %41, %45 : vector<16x32xi1>, vector<16x32xf32>
    %47 = tpu.concatenate %24, %46 in 0 : vector<16x32xf32>, vector<16x32xf32> -> vector<32x32xf32>
    %c0_17 = arith.constant 0 : index
    %c0_18 = arith.constant 0 : index
    %c0_19 = arith.constant 0 : index
    %48 = vector.load %arg3[%c0_17, %c0_18, %c0_19] : memref<9x32x64xf32, #tpu.memory_space<vmem>>, vector<9x32x64xf32>
    %49 = tpu.iota {dimensions = array<i32: 0>} : vector<32x1xi32>
    %c15_i32 = arith.constant 15 : i32
    %50 = vector.broadcast %c15_i32 : i32 to vector<32x1xi32>
    %51 = arith.andi %49, %50 : vector<32x1xi32>
    %c3_i32 = arith.constant 3 : i32
    %52 = vector.broadcast %c3_i32 : i32 to vector<32x1xi32>
    %53 = arith.andi %49, %52 : vector<32x1xi32>
    %cst_20 = arith.constant 0.000000e+00 : f32
    %54 = vector.broadcast %cst_20 : f32 to vector<32x64xf32>
    %cst_21 = arith.constant 0.000000e+00 : f32
    %55 = vector.broadcast %cst_21 : f32 to vector<5x32xf32>
    %56 = vector.extract_strided_slice %47 {offsets = [0, 0], sizes = [27, 32], strides = [1, 1]} : vector<32x32xf32> to vector<27x32xf32>
    %57 = tpu.concatenate %55, %56 in 0 : vector<5x32xf32>, vector<27x32xf32> -> vector<32x32xf32>
    %c4_i32 = arith.constant 4 : i32
    %58 = vector.broadcast %c4_i32 : i32 to vector<32x1xi32>
    %59 = arith.cmpi sge, %51, %58 : vector<32x1xi32>
    %c1_i32 = arith.constant 1 : i32
    %60 = vector.broadcast %c1_i32 : i32 to vector<32x1xi32>
    %61 = arith.cmpi sge, %53, %60 : vector<32x1xi32>
    %62 = arith.andi %59, %61 : vector<32x1xi1>
    %cst_22 = arith.constant 0.000000e+00 : f32
    %63 = vector.shape_cast %62 : vector<32x1xi1> to vector<32x1xi1>
    %64 = vector.broadcast %63 : vector<32x1xi1> to vector<32x32xi1>
    %65 = vector.broadcast %cst_22 : f32 to vector<32x32xf32>
    %66 = arith.select %64, %57, %65 : vector<32x32xi1>, vector<32x32xf32>
    %67 = vector.extract_strided_slice %48 {offsets = [0, 0, 0], sizes = [1, 32, 64], strides = [1, 1, 1]} : vector<9x32x64xf32> to vector<1x32x64xf32>
    %68 = vector.shape_cast %67 : vector<1x32x64xf32> to vector<32x64xf32>
    %cst_23 = arith.constant dense<0.000000e+00> : vector<32x64xf32>
    %69 = tpu.matmul %66, %68, %cst_23 {dimension_numbers = #tpu.dot_dimension_numbers<[1], [0], [0], [1], [0, 0, 1, 1], [], []>} : vector<32x32xf32>, vector<32x64xf32>, vector<32x64xf32> -> vector<32x64xf32>
    %70 = arith.addf %54, %69 : vector<32x64xf32>
    %cst_24 = arith.constant 0.000000e+00 : f32
    %71 = vector.broadcast %cst_24 : f32 to vector<4x32xf32>
    %72 = vector.extract_strided_slice %47 {offsets = [0, 0], sizes = [28, 32], strides = [1, 1]} : vector<32x32xf32> to vector<28x32xf32>
    %73 = tpu.concatenate %71, %72 in 0 : vector<4x32xf32>, vector<28x32xf32> -> vector<32x32xf32>
    %c4_i32_25 = arith.constant 4 : i32
    %74 = vector.broadcast %c4_i32_25 : i32 to vector<32x1xi32>
    %75 = arith.cmpi sge, %51, %74 : vector<32x1xi32>
    %cst_26 = arith.constant 0.000000e+00 : f32
    %76 = vector.shape_cast %75 : vector<32x1xi1> to vector<32x1xi1>
    %77 = vector.broadcast %76 : vector<32x1xi1> to vector<32x32xi1>
    %78 = vector.broadcast %cst_26 : f32 to vector<32x32xf32>
    %79 = arith.select %77, %73, %78 : vector<32x32xi1>, vector<32x32xf32>
    %80 = vector.extract_strided_slice %48 {offsets = [1, 0, 0], sizes = [1, 32, 64], strides = [1, 1, 1]} : vector<9x32x64xf32> to vector<1x32x64xf32>
    %81 = vector.shape_cast %80 : vector<1x32x64xf32> to vector<32x64xf32>
    %cst_27 = arith.constant dense<0.000000e+00> : vector<32x64xf32>
    %82 = tpu.matmul %79, %81, %cst_27 {dimension_numbers = #tpu.dot_dimension_numbers<[1], [0], [0], [1], [0, 0, 1, 1], [], []>} : vector<32x32xf32>, vector<32x64xf32>, vector<32x64xf32> -> vector<32x64xf32>
    %83 = arith.addf %70, %82 : vector<32x64xf32>
    %cst_28 = arith.constant 0.000000e+00 : f32
    %84 = vector.broadcast %cst_28 : f32 to vector<3x32xf32>
    %85 = vector.extract_strided_slice %47 {offsets = [0, 0], sizes = [29, 32], strides = [1, 1]} : vector<32x32xf32> to vector<29x32xf32>
    %86 = tpu.concatenate %84, %85 in 0 : vector<3x32xf32>, vector<29x32xf32> -> vector<32x32xf32>
    %c4_i32_29 = arith.constant 4 : i32
    %87 = vector.broadcast %c4_i32_29 : i32 to vector<32x1xi32>
    %88 = arith.cmpi sge, %51, %87 : vector<32x1xi32>
    %c3_i32_30 = arith.constant 3 : i32
    %89 = vector.broadcast %c3_i32_30 : i32 to vector<32x1xi32>
    %90 = arith.cmpi slt, %53, %89 : vector<32x1xi32>
    %91 = arith.andi %88, %90 : vector<32x1xi1>
    %cst_31 = arith.constant 0.000000e+00 : f32
    %92 = vector.shape_cast %91 : vector<32x1xi1> to vector<32x1xi1>
    %93 = vector.broadcast %92 : vector<32x1xi1> to vector<32x32xi1>
    %94 = vector.broadcast %cst_31 : f32 to vector<32x32xf32>
    %95 = arith.select %93, %86, %94 : vector<32x32xi1>, vector<32x32xf32>
    %96 = vector.extract_strided_slice %48 {offsets = [2, 0, 0], sizes = [1, 32, 64], strides = [1, 1, 1]} : vector<9x32x64xf32> to vector<1x32x64xf32>
    %97 = vector.shape_cast %96 : vector<1x32x64xf32> to vector<32x64xf32>
    %cst_32 = arith.constant dense<0.000000e+00> : vector<32x64xf32>
    %98 = tpu.matmul %95, %97, %cst_32 {dimension_numbers = #tpu.dot_dimension_numbers<[1], [0], [0], [1], [0, 0, 1, 1], [], []>} : vector<32x32xf32>, vector<32x64xf32>, vector<32x64xf32> -> vector<32x64xf32>
    %99 = arith.addf %83, %98 : vector<32x64xf32>
    %cst_33 = arith.constant 0.000000e+00 : f32
    %100 = vector.broadcast %cst_33 : f32 to vector<1x32xf32>
    %101 = vector.extract_strided_slice %47 {offsets = [0, 0], sizes = [31, 32], strides = [1, 1]} : vector<32x32xf32> to vector<31x32xf32>
    %102 = tpu.concatenate %100, %101 in 0 : vector<1x32xf32>, vector<31x32xf32> -> vector<32x32xf32>
    %c1_i32_34 = arith.constant 1 : i32
    %103 = vector.broadcast %c1_i32_34 : i32 to vector<32x1xi32>
    %104 = arith.cmpi sge, %53, %103 : vector<32x1xi32>
    %cst_35 = arith.constant 0.000000e+00 : f32
    %105 = vector.shape_cast %104 : vector<32x1xi1> to vector<32x1xi1>
    %106 = vector.broadcast %105 : vector<32x1xi1> to vector<32x32xi1>
    %107 = vector.broadcast %cst_35 : f32 to vector<32x32xf32>
    %108 = arith.select %106, %102, %107 : vector<32x32xi1>, vector<32x32xf32>
    %109 = vector.extract_strided_slice %48 {offsets = [3, 0, 0], sizes = [1, 32, 64], strides = [1, 1, 1]} : vector<9x32x64xf32> to vector<1x32x64xf32>
    %110 = vector.shape_cast %109 : vector<1x32x64xf32> to vector<32x64xf32>
    %cst_36 = arith.constant dense<0.000000e+00> : vector<32x64xf32>
    %111 = tpu.matmul %108, %110, %cst_36 {dimension_numbers = #tpu.dot_dimension_numbers<[1], [0], [0], [1], [0, 0, 1, 1], [], []>} : vector<32x32xf32>, vector<32x64xf32>, vector<32x64xf32> -> vector<32x64xf32>
    %112 = arith.addf %99, %111 : vector<32x64xf32>
    %113 = vector.extract_strided_slice %48 {offsets = [4, 0, 0], sizes = [1, 32, 64], strides = [1, 1, 1]} : vector<9x32x64xf32> to vector<1x32x64xf32>
    %114 = vector.shape_cast %113 : vector<1x32x64xf32> to vector<32x64xf32>
    %cst_37 = arith.constant dense<0.000000e+00> : vector<32x64xf32>
    %115 = tpu.matmul %47, %114, %cst_37 {dimension_numbers = #tpu.dot_dimension_numbers<[1], [0], [0], [1], [0, 0, 1, 1], [], []>} : vector<32x32xf32>, vector<32x64xf32>, vector<32x64xf32> -> vector<32x64xf32>
    %116 = arith.addf %112, %115 : vector<32x64xf32>
    %cst_38 = arith.constant 0.000000e+00 : f32
    %117 = vector.broadcast %cst_38 : f32 to vector<1x32xf32>
    %118 = vector.extract_strided_slice %47 {offsets = [1, 0], sizes = [31, 32], strides = [1, 1]} : vector<32x32xf32> to vector<31x32xf32>
    %119 = tpu.concatenate %118, %117 in 0 : vector<31x32xf32>, vector<1x32xf32> -> vector<32x32xf32>
    %c3_i32_39 = arith.constant 3 : i32
    %120 = vector.broadcast %c3_i32_39 : i32 to vector<32x1xi32>
    %121 = arith.cmpi slt, %53, %120 : vector<32x1xi32>
    %cst_40 = arith.constant 0.000000e+00 : f32
    %122 = vector.shape_cast %121 : vector<32x1xi1> to vector<32x1xi1>
    %123 = vector.broadcast %122 : vector<32x1xi1> to vector<32x32xi1>
    %124 = vector.broadcast %cst_40 : f32 to vector<32x32xf32>
    %125 = arith.select %123, %119, %124 : vector<32x32xi1>, vector<32x32xf32>
    %126 = vector.extract_strided_slice %48 {offsets = [5, 0, 0], sizes = [1, 32, 64], strides = [1, 1, 1]} : vector<9x32x64xf32> to vector<1x32x64xf32>
    %127 = vector.shape_cast %126 : vector<1x32x64xf32> to vector<32x64xf32>
    %cst_41 = arith.constant dense<0.000000e+00> : vector<32x64xf32>
    %128 = tpu.matmul %125, %127, %cst_41 {dimension_numbers = #tpu.dot_dimension_numbers<[1], [0], [0], [1], [0, 0, 1, 1], [], []>} : vector<32x32xf32>, vector<32x64xf32>, vector<32x64xf32> -> vector<32x64xf32>
    %129 = arith.addf %116, %128 : vector<32x64xf32>
    %cst_42 = arith.constant 0.000000e+00 : f32
    %130 = vector.broadcast %cst_42 : f32 to vector<3x32xf32>
    %131 = vector.extract_strided_slice %47 {offsets = [3, 0], sizes = [29, 32], strides = [1, 1]} : vector<32x32xf32> to vector<29x32xf32>
    %132 = tpu.concatenate %131, %130 in 0 : vector<29x32xf32>, vector<3x32xf32> -> vector<32x32xf32>
    %c12_i32 = arith.constant 12 : i32
    %133 = vector.broadcast %c12_i32 : i32 to vector<32x1xi32>
    %134 = arith.cmpi slt, %51, %133 : vector<32x1xi32>
    %c1_i32_43 = arith.constant 1 : i32
    %135 = vector.broadcast %c1_i32_43 : i32 to vector<32x1xi32>
    %136 = arith.cmpi sge, %53, %135 : vector<32x1xi32>
    %137 = arith.andi %134, %136 : vector<32x1xi1>
    %cst_44 = arith.constant 0.000000e+00 : f32
    %138 = vector.shape_cast %137 : vector<32x1xi1> to vector<32x1xi1>
    %139 = vector.broadcast %138 : vector<32x1xi1> to vector<32x32xi1>
    %140 = vector.broadcast %cst_44 : f32 to vector<32x32xf32>
    %141 = arith.select %139, %132, %140 : vector<32x32xi1>, vector<32x32xf32>
    %142 = vector.extract_strided_slice %48 {offsets = [6, 0, 0], sizes = [1, 32, 64], strides = [1, 1, 1]} : vector<9x32x64xf32> to vector<1x32x64xf32>
    %143 = vector.shape_cast %142 : vector<1x32x64xf32> to vector<32x64xf32>
    %cst_45 = arith.constant dense<0.000000e+00> : vector<32x64xf32>
    %144 = tpu.matmul %141, %143, %cst_45 {dimension_numbers = #tpu.dot_dimension_numbers<[1], [0], [0], [1], [0, 0, 1, 1], [], []>} : vector<32x32xf32>, vector<32x64xf32>, vector<32x64xf32> -> vector<32x64xf32>
    %145 = arith.addf %129, %144 : vector<32x64xf32>
    %cst_46 = arith.constant 0.000000e+00 : f32
    %146 = vector.broadcast %cst_46 : f32 to vector<4x32xf32>
    %147 = vector.extract_strided_slice %47 {offsets = [4, 0], sizes = [28, 32], strides = [1, 1]} : vector<32x32xf32> to vector<28x32xf32>
    %148 = tpu.concatenate %147, %146 in 0 : vector<28x32xf32>, vector<4x32xf32> -> vector<32x32xf32>
    %c12_i32_47 = arith.constant 12 : i32
    %149 = vector.broadcast %c12_i32_47 : i32 to vector<32x1xi32>
    %150 = arith.cmpi slt, %51, %149 : vector<32x1xi32>
    %cst_48 = arith.constant 0.000000e+00 : f32
    %151 = vector.shape_cast %150 : vector<32x1xi1> to vector<32x1xi1>
    %152 = vector.broadcast %151 : vector<32x1xi1> to vector<32x32xi1>
    %153 = vector.broadcast %cst_48 : f32 to vector<32x32xf32>
    %154 = arith.select %152, %148, %153 : vector<32x32xi1>, vector<32x32xf32>
    %155 = vector.extract_strided_slice %48 {offsets = [7, 0, 0], sizes = [1, 32, 64], strides = [1, 1, 1]} : vector<9x32x64xf32> to vector<1x32x64xf32>
    %156 = vector.shape_cast %155 : vector<1x32x64xf32> to vector<32x64xf32>
    %cst_49 = arith.constant dense<0.000000e+00> : vector<32x64xf32>
    %157 = tpu.matmul %154, %156, %cst_49 {dimension_numbers = #tpu.dot_dimension_numbers<[1], [0], [0], [1], [0, 0, 1, 1], [], []>} : vector<32x32xf32>, vector<32x64xf32>, vector<32x64xf32> -> vector<32x64xf32>
    %158 = arith.addf %145, %157 : vector<32x64xf32>
    %cst_50 = arith.constant 0.000000e+00 : f32
    %159 = vector.broadcast %cst_50 : f32 to vector<5x32xf32>
    %160 = vector.extract_strided_slice %47 {offsets = [5, 0], sizes = [27, 32], strides = [1, 1]} : vector<32x32xf32> to vector<27x32xf32>
    %161 = tpu.concatenate %160, %159 in 0 : vector<27x32xf32>, vector<5x32xf32> -> vector<32x32xf32>
    %c12_i32_51 = arith.constant 12 : i32
    %162 = vector.broadcast %c12_i32_51 : i32 to vector<32x1xi32>
    %163 = arith.cmpi slt, %51, %162 : vector<32x1xi32>
    %c3_i32_52 = arith.constant 3 : i32
    %164 = vector.broadcast %c3_i32_52 : i32 to vector<32x1xi32>
    %165 = arith.cmpi slt, %53, %164 : vector<32x1xi32>
    %166 = arith.andi %163, %165 : vector<32x1xi1>
    %cst_53 = arith.constant 0.000000e+00 : f32
    %167 = vector.shape_cast %166 : vector<32x1xi1> to vector<32x1xi1>
    %168 = vector.broadcast %167 : vector<32x1xi1> to vector<32x32xi1>
    %169 = vector.broadcast %cst_53 : f32 to vector<32x32xf32>
    %170 = arith.select %168, %161, %169 : vector<32x32xi1>, vector<32x32xf32>
    %171 = vector.extract_strided_slice %48 {offsets = [8, 0, 0], sizes = [1, 32, 64], strides = [1, 1, 1]} : vector<9x32x64xf32> to vector<1x32x64xf32>
    %172 = vector.shape_cast %171 : vector<1x32x64xf32> to vector<32x64xf32>
    %cst_54 = arith.constant dense<0.000000e+00> : vector<32x64xf32>
    %173 = tpu.matmul %170, %172, %cst_54 {dimension_numbers = #tpu.dot_dimension_numbers<[1], [0], [0], [1], [0, 0, 1, 1], [], []>} : vector<32x32xf32>, vector<32x64xf32>, vector<32x64xf32> -> vector<32x64xf32>
    %174 = arith.addf %158, %173 : vector<32x64xf32>
    %175 = vector.extract_strided_slice %174 {offsets = [0, 0], sizes = [16, 64], strides = [1, 1]} : vector<32x64xf32> to vector<16x64xf32>
    %cst_55 = arith.constant dense<0.000000e+00> : vector<64xf32>
    %176 = vector.multi_reduction <add>, %175, %cst_55 [0] : vector<16x64xf32> to vector<64xf32>
    %177 = vector.shape_cast %176 : vector<64xf32> to vector<1x64xf32>
    %178 = vector.extract_strided_slice %177 {offsets = [0, 0], sizes = [1, 16], strides = [1, 1]} : vector<1x64xf32> to vector<1x16xf32>
    %179 = vector.extract_strided_slice %177 {offsets = [0, 16], sizes = [1, 16], strides = [1, 1]} : vector<1x64xf32> to vector<1x16xf32>
    %180 = arith.addf %178, %179 : vector<1x16xf32>
    %181 = vector.extract_strided_slice %177 {offsets = [0, 32], sizes = [1, 16], strides = [1, 1]} : vector<1x64xf32> to vector<1x16xf32>
    %182 = arith.addf %180, %181 : vector<1x16xf32>
    %183 = vector.extract_strided_slice %177 {offsets = [0, 48], sizes = [1, 16], strides = [1, 1]} : vector<1x64xf32> to vector<1x16xf32>
    %184 = arith.addf %182, %183 : vector<1x16xf32>
    %cst_56 = arith.constant 1.562500e-02 : f32
    %185 = vector.broadcast %cst_56 : f32 to vector<1x16xf32>
    %186 = arith.mulf %184, %185 : vector<1x16xf32>
    %187 = tpu.concatenate %186, %186, %186, %186 in 1 : vector<1x16xf32>, vector<1x16xf32>, vector<1x16xf32>, vector<1x16xf32> -> vector<1x64xf32>
    %188 = vector.broadcast %187 : vector<1x64xf32> to vector<16x64xf32>
    %189 = arith.subf %175, %188 : vector<16x64xf32>
    %190 = arith.mulf %189, %189 : vector<16x64xf32>
    %cst_57 = arith.constant dense<0.000000e+00> : vector<64xf32>
    %191 = vector.multi_reduction <add>, %190, %cst_57 [0] : vector<16x64xf32> to vector<64xf32>
    %192 = vector.shape_cast %191 : vector<64xf32> to vector<1x64xf32>
    %193 = vector.extract_strided_slice %192 {offsets = [0, 0], sizes = [1, 16], strides = [1, 1]} : vector<1x64xf32> to vector<1x16xf32>
    %194 = vector.extract_strided_slice %192 {offsets = [0, 16], sizes = [1, 16], strides = [1, 1]} : vector<1x64xf32> to vector<1x16xf32>
    %195 = arith.addf %193, %194 : vector<1x16xf32>
    %196 = vector.extract_strided_slice %192 {offsets = [0, 32], sizes = [1, 16], strides = [1, 1]} : vector<1x64xf32> to vector<1x16xf32>
    %197 = arith.addf %195, %196 : vector<1x16xf32>
    %198 = vector.extract_strided_slice %192 {offsets = [0, 48], sizes = [1, 16], strides = [1, 1]} : vector<1x64xf32> to vector<1x16xf32>
    %199 = arith.addf %197, %198 : vector<1x16xf32>
    %cst_58 = arith.constant 1.562500e-02 : f32
    %200 = vector.broadcast %cst_58 : f32 to vector<1x16xf32>
    %201 = arith.mulf %199, %200 : vector<1x16xf32>
    %cst_59 = arith.constant 9.99999993E-9 : f32
    %202 = vector.broadcast %cst_59 : f32 to vector<1x16xf32>
    %203 = arith.addf %201, %202 : vector<1x16xf32>
    %204 = math.rsqrt %203 : vector<1x16xf32>
    %205 = tpu.concatenate %204, %204, %204, %204 in 1 : vector<1x16xf32>, vector<1x16xf32>, vector<1x16xf32>, vector<1x16xf32> -> vector<1x64xf32>
    %206 = vector.broadcast %205 : vector<1x64xf32> to vector<16x64xf32>
    %207 = arith.mulf %189, %206 : vector<16x64xf32>
    %cst_60 = arith.constant 0.000000e+00 : f32
    %208 = vector.broadcast %cst_60 : f32 to vector<16x64xf32>
    %209 = arith.cmpf ogt, %207, %208 : vector<16x64xf32>
    %cst_61 = arith.constant 2.000000e-01 : f32
    %210 = vector.broadcast %cst_61 : f32 to vector<16x64xf32>
    %211 = arith.mulf %210, %207 : vector<16x64xf32>
    %212 = arith.select %209, %207, %211 : vector<16x64xi1>, vector<16x64xf32>
    %213 = vector.extract_strided_slice %174 {offsets = [16, 0], sizes = [16, 64], strides = [1, 1]} : vector<32x64xf32> to vector<16x64xf32>
    %cst_62 = arith.constant dense<0.000000e+00> : vector<64xf32>
    %214 = vector.multi_reduction <add>, %213, %cst_62 [0] : vector<16x64xf32> to vector<64xf32>
    %215 = vector.shape_cast %214 : vector<64xf32> to vector<1x64xf32>
    %216 = vector.extract_strided_slice %215 {offsets = [0, 0], sizes = [1, 16], strides = [1, 1]} : vector<1x64xf32> to vector<1x16xf32>
    %217 = vector.extract_strided_slice %215 {offsets = [0, 16], sizes = [1, 16], strides = [1, 1]} : vector<1x64xf32> to vector<1x16xf32>
    %218 = arith.addf %216, %217 : vector<1x16xf32>
    %219 = vector.extract_strided_slice %215 {offsets = [0, 32], sizes = [1, 16], strides = [1, 1]} : vector<1x64xf32> to vector<1x16xf32>
    %220 = arith.addf %218, %219 : vector<1x16xf32>
    %221 = vector.extract_strided_slice %215 {offsets = [0, 48], sizes = [1, 16], strides = [1, 1]} : vector<1x64xf32> to vector<1x16xf32>
    %222 = arith.addf %220, %221 : vector<1x16xf32>
    %cst_63 = arith.constant 1.562500e-02 : f32
    %223 = vector.broadcast %cst_63 : f32 to vector<1x16xf32>
    %224 = arith.mulf %222, %223 : vector<1x16xf32>
    %225 = tpu.concatenate %224, %224, %224, %224 in 1 : vector<1x16xf32>, vector<1x16xf32>, vector<1x16xf32>, vector<1x16xf32> -> vector<1x64xf32>
    %226 = vector.broadcast %225 : vector<1x64xf32> to vector<16x64xf32>
    %227 = arith.subf %213, %226 : vector<16x64xf32>
    %228 = arith.mulf %227, %227 : vector<16x64xf32>
    %cst_64 = arith.constant dense<0.000000e+00> : vector<64xf32>
    %229 = vector.multi_reduction <add>, %228, %cst_64 [0] : vector<16x64xf32> to vector<64xf32>
    %230 = vector.shape_cast %229 : vector<64xf32> to vector<1x64xf32>
    %231 = vector.extract_strided_slice %230 {offsets = [0, 0], sizes = [1, 16], strides = [1, 1]} : vector<1x64xf32> to vector<1x16xf32>
    %232 = vector.extract_strided_slice %230 {offsets = [0, 16], sizes = [1, 16], strides = [1, 1]} : vector<1x64xf32> to vector<1x16xf32>
    %233 = arith.addf %231, %232 : vector<1x16xf32>
    %234 = vector.extract_strided_slice %230 {offsets = [0, 32], sizes = [1, 16], strides = [1, 1]} : vector<1x64xf32> to vector<1x16xf32>
    %235 = arith.addf %233, %234 : vector<1x16xf32>
    %236 = vector.extract_strided_slice %230 {offsets = [0, 48], sizes = [1, 16], strides = [1, 1]} : vector<1x64xf32> to vector<1x16xf32>
    %237 = arith.addf %235, %236 : vector<1x16xf32>
    %cst_65 = arith.constant 1.562500e-02 : f32
    %238 = vector.broadcast %cst_65 : f32 to vector<1x16xf32>
    %239 = arith.mulf %237, %238 : vector<1x16xf32>
    %cst_66 = arith.constant 9.99999993E-9 : f32
    %240 = vector.broadcast %cst_66 : f32 to vector<1x16xf32>
    %241 = arith.addf %239, %240 : vector<1x16xf32>
    %242 = math.rsqrt %241 : vector<1x16xf32>
    %243 = tpu.concatenate %242, %242, %242, %242 in 1 : vector<1x16xf32>, vector<1x16xf32>, vector<1x16xf32>, vector<1x16xf32> -> vector<1x64xf32>
    %244 = vector.broadcast %243 : vector<1x64xf32> to vector<16x64xf32>
    %245 = arith.mulf %227, %244 : vector<16x64xf32>
    %cst_67 = arith.constant 0.000000e+00 : f32
    %246 = vector.broadcast %cst_67 : f32 to vector<16x64xf32>
    %247 = arith.cmpf ogt, %245, %246 : vector<16x64xf32>
    %cst_68 = arith.constant 2.000000e-01 : f32
    %248 = vector.broadcast %cst_68 : f32 to vector<16x64xf32>
    %249 = arith.mulf %248, %245 : vector<16x64xf32>
    %250 = arith.select %247, %245, %249 : vector<16x64xi1>, vector<16x64xf32>
    %251 = tpu.concatenate %212, %250 in 0 : vector<16x64xf32>, vector<16x64xf32> -> vector<32x64xf32>
    %252 = arith.truncf %251 : vector<32x64xf32> to vector<32x64xbf16>
    %c0_69 = arith.constant 0 : index
    %c0_70 = arith.constant 0 : index
    %253 = vector.load %arg4[%c0_69, %c0_70] : memref<32x64xbf16, #tpu.memory_space<vmem>>, vector<32x64xbf16>
    tpu.vector_store %arg4[%c0_69, %c0_70], %252 {strides = array<i32>} : memref<32x64xbf16, #tpu.memory_space<vmem>>, vector<32x64xbf16>,
    return
  }
  func.func @transform_0(%arg0: i32) -> (i32, i32) {
    %c0_i32 = arith.constant 0 : i32
    %c0_i32_0 = arith.constant 0 : i32
    %c0_i32_1 = arith.constant 0 : i32
    return %c0_i32, %c0_i32_0 : i32, i32
  }
  func.func @transform_1(%arg0: i32) -> (i32, i32) {
    %c0_i32 = arith.constant 0 : i32
    %c0_i32_0 = arith.constant 0 : i32
    %c0_i32_1 = arith.constant 0 : i32
    return %c0_i32, %c0_i32_0 : i32, i32
  }
  func.func @transform_2(%arg0: i32) -> (i32, i32, i32) {
    %c0_i32 = arith.constant 0 : i32
    %c0_i32_0 = arith.constant 0 : i32
    %c0_i32_1 = arith.constant 0 : i32
    %c0_i32_2 = arith.constant 0 : i32
    return %c0_i32, %c0_i32_0, %c0_i32_1 : i32, i32, i32
  }
  func.func @transform_3(%arg0: i32) -> (i32, i32) {
    %c0_i32 = arith.constant 0 : i32
    %c0_i32_0 = arith.constant 0 : i32
    %c0_i32_1 = arith.constant 0 : i32
    return %c0_i32, %c0_i32_0 : i32, i32
  }
}

module attributes {stable_mosaic.version = 11 : i64} {
  func.func @kernel(%arg0: i32, %arg1: memref<16x128xbf16, #tpu.memory_space<vmem>>, %arg2: memref<9x12x16xf32, #tpu.memory_space<vmem>>, %arg3: memref<12x128xf32, #tpu.memory_space<vmem>>) attributes {dimension_semantics = [#tpu.dimension_semantics<arbitrary>], iteration_bounds = array<i64: 1>, scalar_prefetch = 0 : i64, scratch_operands = 0 : i64, tpu.core_type = #tpu.core_type<tc>, window_params = [{pipeline_mode = #tpu.pipeline_mode<synchronous>, transform_indices = @transform_0, window_bounds = array<i64: 16, 128>}, {pipeline_mode = #tpu.pipeline_mode<synchronous>, transform_indices = @transform_1, window_bounds = array<i64: 9, 12, 16>}, {pipeline_mode = #tpu.pipeline_mode<synchronous>, transform_indices = @transform_2, window_bounds = array<i64: 12, 128>}]} {
    %c0 = arith.constant 0 : index
    %c0_0 = arith.constant 0 : index
    %0 = vector.load %arg1[%c0, %c0_0] : memref<16x128xbf16, #tpu.memory_space<vmem>>, vector<16x128xbf16>
    %1 = arith.extf %0 : vector<16x128xbf16> to vector<16x128xf32>
    %c0_1 = arith.constant 0 : index
    %c0_2 = arith.constant 0 : index
    %c0_3 = arith.constant 0 : index
    %2 = vector.load %arg2[%c0_1, %c0_2, %c0_3] : memref<9x12x16xf32, #tpu.memory_space<vmem>>, vector<9x12x16xf32>
    %3 = tpu.iota {dimensions = array<i32: 1>} : vector<1x128xi32>
    %c63_i32 = arith.constant 63 : i32
    %4 = vector.broadcast %c63_i32 : i32 to vector<1x128xi32>
    %5 = arith.andi %3, %4 : vector<1x128xi32>
    %c7_i32 = arith.constant 7 : i32
    %6 = vector.broadcast %c7_i32 : i32 to vector<1x128xi32>
    %7 = arith.andi %3, %6 : vector<1x128xi32>
    %cst = arith.constant 0.000000e+00 : f32
    %8 = vector.broadcast %cst : f32 to vector<12x128xf32>
    %cst_4 = arith.constant 0.000000e+00 : f32
    %9 = vector.broadcast %cst_4 : f32 to vector<16x9xf32>
    %10 = vector.extract_strided_slice %1 {offsets = [0, 0], sizes = [16, 119], strides = [1, 1]} : vector<16x128xf32> to vector<16x119xf32>
    %11 = tpu.concatenate %9, %10 in 1 : vector<16x9xf32>, vector<16x119xf32> -> vector<16x128xf32>
    %c8_i32 = arith.constant 8 : i32
    %12 = vector.broadcast %c8_i32 : i32 to vector<1x128xi32>
    %13 = arith.cmpi sge, %5, %12 : vector<1x128xi32>
    %c1_i32 = arith.constant 1 : i32
    %14 = vector.broadcast %c1_i32 : i32 to vector<1x128xi32>
    %15 = arith.cmpi sge, %7, %14 : vector<1x128xi32>
    %16 = arith.andi %13, %15 : vector<1x128xi1>
    %cst_5 = arith.constant 0.000000e+00 : f32
    %17 = vector.shape_cast %16 : vector<1x128xi1> to vector<1x128xi1>
    %18 = vector.broadcast %17 : vector<1x128xi1> to vector<16x128xi1>
    %19 = vector.broadcast %cst_5 : f32 to vector<16x128xf32>
    %20 = arith.select %18, %11, %19 : vector<16x128xi1>, vector<16x128xf32>
    %21 = vector.extract_strided_slice %2 {offsets = [0, 0, 0], sizes = [1, 12, 16], strides = [1, 1, 1]} : vector<9x12x16xf32> to vector<1x12x16xf32>
    %22 = vector.shape_cast %21 : vector<1x12x16xf32> to vector<12x16xf32>
    %cst_6 = arith.constant dense<0.000000e+00> : vector<12x128xf32>
    %23 = tpu.matmul %22, %20, %cst_6 {dimension_numbers = #tpu.dot_dimension_numbers<[1], [0], [0], [1], [0, 0, 1, 1], [], []>} : vector<12x16xf32>, vector<16x128xf32>, vector<12x128xf32> -> vector<12x128xf32>
    %24 = arith.addf %8, %23 : vector<12x128xf32>
    %cst_7 = arith.constant 0.000000e+00 : f32
    %25 = vector.broadcast %cst_7 : f32 to vector<16x8xf32>
    %26 = vector.extract_strided_slice %1 {offsets = [0, 0], sizes = [16, 120], strides = [1, 1]} : vector<16x128xf32> to vector<16x120xf32>
    %27 = tpu.concatenate %25, %26 in 1 : vector<16x8xf32>, vector<16x120xf32> -> vector<16x128xf32>
    %c8_i32_8 = arith.constant 8 : i32
    %28 = vector.broadcast %c8_i32_8 : i32 to vector<1x128xi32>
    %29 = arith.cmpi sge, %5, %28 : vector<1x128xi32>
    %cst_9 = arith.constant 0.000000e+00 : f32
    %30 = vector.shape_cast %29 : vector<1x128xi1> to vector<1x128xi1>
    %31 = vector.broadcast %30 : vector<1x128xi1> to vector<16x128xi1>
    %32 = vector.broadcast %cst_9 : f32 to vector<16x128xf32>
    %33 = arith.select %31, %27, %32 : vector<16x128xi1>, vector<16x128xf32>
    %34 = vector.extract_strided_slice %2 {offsets = [1, 0, 0], sizes = [1, 12, 16], strides = [1, 1, 1]} : vector<9x12x16xf32> to vector<1x12x16xf32>
    %35 = vector.shape_cast %34 : vector<1x12x16xf32> to vector<12x16xf32>
    %cst_10 = arith.constant dense<0.000000e+00> : vector<12x128xf32>
    %36 = tpu.matmul %35, %33, %cst_10 {dimension_numbers = #tpu.dot_dimension_numbers<[1], [0], [0], [1], [0, 0, 1, 1], [], []>} : vector<12x16xf32>, vector<16x128xf32>, vector<12x128xf32> -> vector<12x128xf32>
    %37 = arith.addf %24, %36 : vector<12x128xf32>
    %cst_11 = arith.constant 0.000000e+00 : f32
    %38 = vector.broadcast %cst_11 : f32 to vector<16x7xf32>
    %39 = vector.extract_strided_slice %1 {offsets = [0, 0], sizes = [16, 121], strides = [1, 1]} : vector<16x128xf32> to vector<16x121xf32>
    %40 = tpu.concatenate %38, %39 in 1 : vector<16x7xf32>, vector<16x121xf32> -> vector<16x128xf32>
    %c8_i32_12 = arith.constant 8 : i32
    %41 = vector.broadcast %c8_i32_12 : i32 to vector<1x128xi32>
    %42 = arith.cmpi sge, %5, %41 : vector<1x128xi32>
    %c7_i32_13 = arith.constant 7 : i32
    %43 = vector.broadcast %c7_i32_13 : i32 to vector<1x128xi32>
    %44 = arith.cmpi slt, %7, %43 : vector<1x128xi32>
    %45 = arith.andi %42, %44 : vector<1x128xi1>
    %cst_14 = arith.constant 0.000000e+00 : f32
    %46 = vector.shape_cast %45 : vector<1x128xi1> to vector<1x128xi1>
    %47 = vector.broadcast %46 : vector<1x128xi1> to vector<16x128xi1>
    %48 = vector.broadcast %cst_14 : f32 to vector<16x128xf32>
    %49 = arith.select %47, %40, %48 : vector<16x128xi1>, vector<16x128xf32>
    %50 = vector.extract_strided_slice %2 {offsets = [2, 0, 0], sizes = [1, 12, 16], strides = [1, 1, 1]} : vector<9x12x16xf32> to vector<1x12x16xf32>
    %51 = vector.shape_cast %50 : vector<1x12x16xf32> to vector<12x16xf32>
    %cst_15 = arith.constant dense<0.000000e+00> : vector<12x128xf32>
    %52 = tpu.matmul %51, %49, %cst_15 {dimension_numbers = #tpu.dot_dimension_numbers<[1], [0], [0], [1], [0, 0, 1, 1], [], []>} : vector<12x16xf32>, vector<16x128xf32>, vector<12x128xf32> -> vector<12x128xf32>
    %53 = arith.addf %37, %52 : vector<12x128xf32>
    %cst_16 = arith.constant 0.000000e+00 : f32
    %54 = vector.broadcast %cst_16 : f32 to vector<16x1xf32>
    %55 = vector.extract_strided_slice %1 {offsets = [0, 0], sizes = [16, 127], strides = [1, 1]} : vector<16x128xf32> to vector<16x127xf32>
    %56 = tpu.concatenate %54, %55 in 1 : vector<16x1xf32>, vector<16x127xf32> -> vector<16x128xf32>
    %c1_i32_17 = arith.constant 1 : i32
    %57 = vector.broadcast %c1_i32_17 : i32 to vector<1x128xi32>
    %58 = arith.cmpi sge, %7, %57 : vector<1x128xi32>
    %cst_18 = arith.constant 0.000000e+00 : f32
    %59 = vector.shape_cast %58 : vector<1x128xi1> to vector<1x128xi1>
    %60 = vector.broadcast %59 : vector<1x128xi1> to vector<16x128xi1>
    %61 = vector.broadcast %cst_18 : f32 to vector<16x128xf32>
    %62 = arith.select %60, %56, %61 : vector<16x128xi1>, vector<16x128xf32>
    %63 = vector.extract_strided_slice %2 {offsets = [3, 0, 0], sizes = [1, 12, 16], strides = [1, 1, 1]} : vector<9x12x16xf32> to vector<1x12x16xf32>
    %64 = vector.shape_cast %63 : vector<1x12x16xf32> to vector<12x16xf32>
    %cst_19 = arith.constant dense<0.000000e+00> : vector<12x128xf32>
    %65 = tpu.matmul %64, %62, %cst_19 {dimension_numbers = #tpu.dot_dimension_numbers<[1], [0], [0], [1], [0, 0, 1, 1], [], []>} : vector<12x16xf32>, vector<16x128xf32>, vector<12x128xf32> -> vector<12x128xf32>
    %66 = arith.addf %53, %65 : vector<12x128xf32>
    %67 = vector.extract_strided_slice %2 {offsets = [4, 0, 0], sizes = [1, 12, 16], strides = [1, 1, 1]} : vector<9x12x16xf32> to vector<1x12x16xf32>
    %68 = vector.shape_cast %67 : vector<1x12x16xf32> to vector<12x16xf32>
    %cst_20 = arith.constant dense<0.000000e+00> : vector<12x128xf32>
    %69 = tpu.matmul %68, %1, %cst_20 {dimension_numbers = #tpu.dot_dimension_numbers<[1], [0], [0], [1], [0, 0, 1, 1], [], []>} : vector<12x16xf32>, vector<16x128xf32>, vector<12x128xf32> -> vector<12x128xf32>
    %70 = arith.addf %66, %69 : vector<12x128xf32>
    %cst_21 = arith.constant 0.000000e+00 : f32
    %71 = vector.broadcast %cst_21 : f32 to vector<16x1xf32>
    %72 = vector.extract_strided_slice %1 {offsets = [0, 1], sizes = [16, 127], strides = [1, 1]} : vector<16x128xf32> to vector<16x127xf32>
    %73 = tpu.concatenate %72, %71 in 1 : vector<16x127xf32>, vector<16x1xf32> -> vector<16x128xf32>
    %c7_i32_22 = arith.constant 7 : i32
    %74 = vector.broadcast %c7_i32_22 : i32 to vector<1x128xi32>
    %75 = arith.cmpi slt, %7, %74 : vector<1x128xi32>
    %cst_23 = arith.constant 0.000000e+00 : f32
    %76 = vector.shape_cast %75 : vector<1x128xi1> to vector<1x128xi1>
    %77 = vector.broadcast %76 : vector<1x128xi1> to vector<16x128xi1>
    %78 = vector.broadcast %cst_23 : f32 to vector<16x128xf32>
    %79 = arith.select %77, %73, %78 : vector<16x128xi1>, vector<16x128xf32>
    %80 = vector.extract_strided_slice %2 {offsets = [5, 0, 0], sizes = [1, 12, 16], strides = [1, 1, 1]} : vector<9x12x16xf32> to vector<1x12x16xf32>
    %81 = vector.shape_cast %80 : vector<1x12x16xf32> to vector<12x16xf32>
    %cst_24 = arith.constant dense<0.000000e+00> : vector<12x128xf32>
    %82 = tpu.matmul %81, %79, %cst_24 {dimension_numbers = #tpu.dot_dimension_numbers<[1], [0], [0], [1], [0, 0, 1, 1], [], []>} : vector<12x16xf32>, vector<16x128xf32>, vector<12x128xf32> -> vector<12x128xf32>
    %83 = arith.addf %70, %82 : vector<12x128xf32>
    %cst_25 = arith.constant 0.000000e+00 : f32
    %84 = vector.broadcast %cst_25 : f32 to vector<16x7xf32>
    %85 = vector.extract_strided_slice %1 {offsets = [0, 7], sizes = [16, 121], strides = [1, 1]} : vector<16x128xf32> to vector<16x121xf32>
    %86 = tpu.concatenate %85, %84 in 1 : vector<16x121xf32>, vector<16x7xf32> -> vector<16x128xf32>
    %c56_i32 = arith.constant 56 : i32
    %87 = vector.broadcast %c56_i32 : i32 to vector<1x128xi32>
    %88 = arith.cmpi slt, %5, %87 : vector<1x128xi32>
    %c1_i32_26 = arith.constant 1 : i32
    %89 = vector.broadcast %c1_i32_26 : i32 to vector<1x128xi32>
    %90 = arith.cmpi sge, %7, %89 : vector<1x128xi32>
    %91 = arith.andi %88, %90 : vector<1x128xi1>
    %cst_27 = arith.constant 0.000000e+00 : f32
    %92 = vector.shape_cast %91 : vector<1x128xi1> to vector<1x128xi1>
    %93 = vector.broadcast %92 : vector<1x128xi1> to vector<16x128xi1>
    %94 = vector.broadcast %cst_27 : f32 to vector<16x128xf32>
    %95 = arith.select %93, %86, %94 : vector<16x128xi1>, vector<16x128xf32>
    %96 = vector.extract_strided_slice %2 {offsets = [6, 0, 0], sizes = [1, 12, 16], strides = [1, 1, 1]} : vector<9x12x16xf32> to vector<1x12x16xf32>
    %97 = vector.shape_cast %96 : vector<1x12x16xf32> to vector<12x16xf32>
    %cst_28 = arith.constant dense<0.000000e+00> : vector<12x128xf32>
    %98 = tpu.matmul %97, %95, %cst_28 {dimension_numbers = #tpu.dot_dimension_numbers<[1], [0], [0], [1], [0, 0, 1, 1], [], []>} : vector<12x16xf32>, vector<16x128xf32>, vector<12x128xf32> -> vector<12x128xf32>
    %99 = arith.addf %83, %98 : vector<12x128xf32>
    %cst_29 = arith.constant 0.000000e+00 : f32
    %100 = vector.broadcast %cst_29 : f32 to vector<16x8xf32>
    %101 = vector.extract_strided_slice %1 {offsets = [0, 8], sizes = [16, 120], strides = [1, 1]} : vector<16x128xf32> to vector<16x120xf32>
    %102 = tpu.concatenate %101, %100 in 1 : vector<16x120xf32>, vector<16x8xf32> -> vector<16x128xf32>
    %c56_i32_30 = arith.constant 56 : i32
    %103 = vector.broadcast %c56_i32_30 : i32 to vector<1x128xi32>
    %104 = arith.cmpi slt, %5, %103 : vector<1x128xi32>
    %cst_31 = arith.constant 0.000000e+00 : f32
    %105 = vector.shape_cast %104 : vector<1x128xi1> to vector<1x128xi1>
    %106 = vector.broadcast %105 : vector<1x128xi1> to vector<16x128xi1>
    %107 = vector.broadcast %cst_31 : f32 to vector<16x128xf32>
    %108 = arith.select %106, %102, %107 : vector<16x128xi1>, vector<16x128xf32>
    %109 = vector.extract_strided_slice %2 {offsets = [7, 0, 0], sizes = [1, 12, 16], strides = [1, 1, 1]} : vector<9x12x16xf32> to vector<1x12x16xf32>
    %110 = vector.shape_cast %109 : vector<1x12x16xf32> to vector<12x16xf32>
    %cst_32 = arith.constant dense<0.000000e+00> : vector<12x128xf32>
    %111 = tpu.matmul %110, %108, %cst_32 {dimension_numbers = #tpu.dot_dimension_numbers<[1], [0], [0], [1], [0, 0, 1, 1], [], []>} : vector<12x16xf32>, vector<16x128xf32>, vector<12x128xf32> -> vector<12x128xf32>
    %112 = arith.addf %99, %111 : vector<12x128xf32>
    %cst_33 = arith.constant 0.000000e+00 : f32
    %113 = vector.broadcast %cst_33 : f32 to vector<16x9xf32>
    %114 = vector.extract_strided_slice %1 {offsets = [0, 9], sizes = [16, 119], strides = [1, 1]} : vector<16x128xf32> to vector<16x119xf32>
    %115 = tpu.concatenate %114, %113 in 1 : vector<16x119xf32>, vector<16x9xf32> -> vector<16x128xf32>
    %c56_i32_34 = arith.constant 56 : i32
    %116 = vector.broadcast %c56_i32_34 : i32 to vector<1x128xi32>
    %117 = arith.cmpi slt, %5, %116 : vector<1x128xi32>
    %c7_i32_35 = arith.constant 7 : i32
    %118 = vector.broadcast %c7_i32_35 : i32 to vector<1x128xi32>
    %119 = arith.cmpi slt, %7, %118 : vector<1x128xi32>
    %120 = arith.andi %117, %119 : vector<1x128xi1>
    %cst_36 = arith.constant 0.000000e+00 : f32
    %121 = vector.shape_cast %120 : vector<1x128xi1> to vector<1x128xi1>
    %122 = vector.broadcast %121 : vector<1x128xi1> to vector<16x128xi1>
    %123 = vector.broadcast %cst_36 : f32 to vector<16x128xf32>
    %124 = arith.select %122, %115, %123 : vector<16x128xi1>, vector<16x128xf32>
    %125 = vector.extract_strided_slice %2 {offsets = [8, 0, 0], sizes = [1, 12, 16], strides = [1, 1, 1]} : vector<9x12x16xf32> to vector<1x12x16xf32>
    %126 = vector.shape_cast %125 : vector<1x12x16xf32> to vector<12x16xf32>
    %cst_37 = arith.constant dense<0.000000e+00> : vector<12x128xf32>
    %127 = tpu.matmul %126, %124, %cst_37 {dimension_numbers = #tpu.dot_dimension_numbers<[1], [0], [0], [1], [0, 0, 1, 1], [], []>} : vector<12x16xf32>, vector<16x128xf32>, vector<12x128xf32> -> vector<12x128xf32>
    %128 = arith.addf %112, %127 : vector<12x128xf32>
    %129 = math.tanh %128 : vector<12x128xf32>
    %c0_38 = arith.constant 0 : index
    %c0_39 = arith.constant 0 : index
    %130 = vector.load %arg3[%c0_38, %c0_39] : memref<12x128xf32, #tpu.memory_space<vmem>>, vector<12x128xf32>
    tpu.vector_store %arg3[%c0_38, %c0_39], %129 {strides = array<i32>} : memref<12x128xf32, #tpu.memory_space<vmem>>, vector<12x128xf32>,
    return
  }
  func.func @transform_0(%arg0: i32) -> (i32, i32) {
    %c0_i32 = arith.constant 0 : i32
    %c0_i32_0 = arith.constant 0 : i32
    %c0_i32_1 = arith.constant 0 : i32
    return %c0_i32, %c0_i32_0 : i32, i32
  }
  func.func @transform_1(%arg0: i32) -> (i32, i32, i32) {
    %c0_i32 = arith.constant 0 : i32
    %c0_i32_0 = arith.constant 0 : i32
    %c0_i32_1 = arith.constant 0 : i32
    %c0_i32_2 = arith.constant 0 : i32
    return %c0_i32, %c0_i32_0, %c0_i32_1 : i32, i32, i32
  }
  func.func @transform_2(%arg0: i32) -> (i32, i32) {
    %c0_i32 = arith.constant 0 : i32
    %c0_i32_0 = arith.constant 0 : i32
    %c0_i32_1 = arith.constant 0 : i32
    return %c0_i32, %c0_i32_0 : i32, i32
  }
}

</mosaic_0001>

<bundles_post_ra>
// kernel: g_forward.3
= control target key start
LH: loop header
LB: loop body
LE: loop exit
PB: predicated region body
PF: predicated region fallthrough
CT: control target
= control target key end

     0   :  { %vm68_vm0 = vcmask 130048   ;;  %s1160_s18 = smov 8   ;;  %s1161_s19 = smov 9   ;;  %v33_v8 = vlaneseq  ;;  %vm61_vm3 = vcmask 64512   ;;  %vm45_vm4 = vcmask 72704   ;;  %s1396_s0 = inlined_call_operand.vmem [shape: bf16[16,128], index: 0, kind: input, shape index: {}]   ;;  %s1397_s1 = inlined_call_operand.vmem [shape: f32[9,12,16], index: 1, kind: input, shape index: {}]   ;;  %s1398_s2 = inlined_call_operand.vmem [shape: f32[12,128], index: 2, kind: output, shape index: {}]  }
   0x1   :  { %v938_v0 = vld [vmem:[%s1396_s0] sm:$0xff]   ;;  %v17_v4 = vld [vmem:[%s1397_s1 + $0x10] sm:$0xff]  ;;  %v24_v6 = vld [vmem:[%s1397_s1 + $0x48] sm:$0xf]  ;;  %s1162_s20 = smov 127   ;;  %s1163_s21 = smov 121  }
   0x2   :  { %v23_v1 = vld [vmem:[%s1397_s1 + $0x40] sm:$0xff]  ;;  %v939_v2 = vunpack.c.l.bf16 %v938_v0  ;;  %v940_v3 = vunpack.c.h.bf16 %v938_v0  ;;  %1065 = vmatprep.subr.bf16.mxu0 %v938_v0  ;;  %981 = vmatprep.mubr.msk.f32.mxu1 %vm68_vm0, %v17_v4  ;;  %v25_v7 = vld [vmem:[%s1397_s1 + $0x50] sm:$0xff]  ;;  %s1164_s22 = smov 7   ;;  %s1165_s23 = smov 120   ;;  %v34_v9 = vand.u32 127, %v33_v8  ;;  %vm514_vm5 = vcmask 1039360  }
   0x3   :  { %1009 = vmatprep.mubr.msk.f32.mxu0 %vm68_vm0, %v23_v1  ;;  %1067 = vmatpush3.bf16.msra.mxu0 %v938_v0  ;;  %s1166_s24 = smov 1   ;;  %s1167_s25 = smov 119   ;;  %vm610_vm10 = vcmask 990208   ;;  %v18_v37 = vld [vmem:[%s1397_s1 + $0x18] sm:$0xf]  ;;  %vm237_vm14 = vcmask 56320  }
   0x4   :  { %v1116_v5 = vpack.i.bf16 %v940_v3, %v939_v2  ;;  %v35_v10 = vand.u32 63, %v34_v9  ;;  %v36_v11 = vand.u32 7, %v34_v9  ;;  %vm708_vm15 = vcmask 982016   ;;  %v15_v46 = vld [vmem:[%s1397_s1] sm:$0xff]  ;;  %v26_v50 = vld [vmem:[%s1397_s1 + $0x58] sm:$0xf] }
   0x5   :  { %v27_v58 = vld [vmem:[%s1397_s1 + $0x60] sm:$0xff]  ;;  %v16_v1 = vld [vmem:[%s1397_s1 + $0x8] sm:$0xf]  ;;  %v30_v14 = vld [vmem:[%s1397_s1 + $0x78] sm:$0xf] }
   0x6   :  { %1117 = vrot.lane.b32.xlu0 %v1116_v5, %s1160_s18  ;;  %1127 = vrot.lane.b32.xlu1 %v1116_v5, %s1161_s19  ;;  %vm1202_vm1 = vcmp.ge.s32.totalorder %v36_v11, 1  ;;  %vm1206_vm2 = vcmp.ge.s32.totalorder %v35_v10, 8  ;;  %vm1214_vm7 = vcmp.lt.s32.totalorder %v35_v10, 56  ;;  %vm1221_vm9 = vcmp.lt.s32.totalorder %v36_v11, 7  ;;  %v28_v8 = vld [vmem:[%s1397_s1 + $0x68] sm:$0xf] }
   0x7   :  { %1010 = vmatmul.mubr.msk.f32.vlgmr.msra.gmra.mrb[0].mxu0 %vm68_vm0, %v24_v6  ;;  %vm50_vm6 = vmand %vm1206_vm2, %vm1202_vm1  ;;  %v29_v10 = vld [vmem:[%s1397_s1 + $0x70] sm:$0xff]  ;;  %v20_v11 = vld [vmem:[%s1397_s1 + $0x28] sm:$0xf] }
   0x8   :  { %1016 = vmatprep.mubr.msk.f32.mxu0 %vm68_vm0, %v25_v7  ;;  %vm1041_vm8 = vmpackc.low %vm1206_vm2, %vm1206_vm2  ;;  %v32_v12 = vld [vmem:[%s1397_s1 + $0x88] sm:$0xf] }
   0x9   :  { %vm1231_vm11 = vmpackc.low %vm50_vm6, %vm50_vm6  ;;  %vm335_vm6 = vcmask 7168  }
   0xa   :  { %1122 = vrot.lane.b32.xlu0 %v1116_v5, %s1162_s20  ;;  %1132 = vrot.lane.b32.xlu1 %v1116_v5, %s1163_s21  ;;  %vm614_vm12 = vmand %vm1214_vm7, %vm1202_vm1 }
   0xb   :  { %vm1069_vm13 = vmpackc.low %vm1221_vm9, %vm1221_vm9 }
   0xe   :  { %1137 = vrot.lane.b32.xlu0 %v1116_v5, %s1164_s22  ;;  %1142 = vrot.lane.b32.xlu1 %v1116_v5, %s1165_s23 }
  0x12   :  { %1147 = vrot.lane.b32.xlu0 %v1116_v5, %s1166_s24  ;;  %1152 = vrot.lane.b32.xlu1 %v1116_v5, %s1167_s25  ;;  %v19_v5 = vld [vmem:[%s1397_s1 + $0x20] sm:$0xff] }
  0x78   :  { %v1118_v13 = vpop.permute.xlu0 %1117  ;;  %v1128_v15 = vpop.permute.xlu1 %1127 }
  0x79   :  { %v1120_v16 = vunpack.i.h.bf16 %v1118_v13  ;;  %v1119_v17 = vunpack.i.l.bf16 %v1118_v13  ;;  %v1130_v18 = vunpack.i.h.bf16 %v1128_v15  ;;  %v1129_v19 = vunpack.i.l.bf16 %v1128_v15  ;;  %v21_v13 = vld [vmem:[%s1397_s1 + $0x30] sm:$0xff]  ;;  %v31_v15 = vld [vmem:[%s1397_s1 + $0x80] sm:$0xff] }
  0x7b   :  { %v62_v21 = vsel %vm61_vm3, 0.0, %v1119_v17  ;;  %v63_v22 = vsel %vm61_vm3, 0.0, %v1120_v16  ;;  %v47_v23 = vsel %vm45_vm4, 0.0, %v1130_v18  ;;  %v46_v24 = vsel %vm45_vm4, 0.0, %v1129_v19  ;;  %vm241_vm3 = vmand %vm1206_vm2, %vm1221_vm9  ;;  %v22_v16 = vld [vmem:[%s1397_s1 + $0x38] sm:$0xf] }
  0x7c   :  { %v1123_v25 = vpop.permute.xlu0 %1122  ;;  %v1040_v26 = vpack.c.bf16 %v63_v22, %v62_v21  ;;  %v1046_v27 = vpack.c.bf16 %v47_v23, %v46_v24  ;;  %v1133_v29 = vpop.permute.xlu1 %1132  ;;  %vm1272_vm4 = vmpackc.low %vm614_vm12, %vm614_vm12 }
  0x7d   :  { %v1125_v30 = vunpack.i.h.bf16 %v1123_v25  ;;  %v1124_v31 = vunpack.i.l.bf16 %v1123_v25  ;;  %v1135_v32 = vunpack.i.h.bf16 %v1133_v29  ;;  %v1134_v33 = vunpack.i.l.bf16 %v1133_v29  ;;  %vm1081_vm2 = vmpackc.low %vm1214_vm7, %vm1214_vm7 }
  0x7e   :  { %1042 = vmatprep.subr.msk.bf16.mxu1 %vm1041_vm8, %v1040_v26 }
  0x7f   :  { %v516_v35 = vsel %vm514_vm5, %v1125_v30, 0.0  ;;  %v515_v36 = vsel %vm514_vm5, %v1124_v31, 0.0  ;;  %1045 = vmatpush3.bf16.msk.msra.mxu1 %vm1041_vm8, %v1040_v26  ;;  %v612_v38 = vsel %vm610_vm10, %v1135_v32, 0.0  ;;  %v611_v39 = vsel %vm610_vm10, %v1134_v33, 0.0  ;;  %vm1302_vm5 = vmpackc.low %vm241_vm3, %vm241_vm3 }
  0x80   :  { %v1068_v40 = vpack.c.bf16 %v516_v35, %v515_v36  ;;  %v1074_v41 = vpack.c.bf16 %v612_v38, %v611_v39  ;;  %1048 = vmatprep.subr.msk.bf16.mxu1 %vm1231_vm11, %v1046_v27  ;;  %v1138_v42 = vpop.permute.xlu0 %1137  ;;  %v1143_v43 = vpop.permute.xlu1 %1142  ;;  %vm804_vm8 = vcmask 973824   ;;  %vm1059_vm10 = vmpackc.low %vm1202_vm1, %vm1202_vm1 }
  0x81   :  { %v1140_v44 = vunpack.i.h.bf16 %v1138_v42  ;;  %v1139_v45 = vunpack.i.l.bf16 %v1138_v42  ;;  %v1145_v48 = vunpack.i.h.bf16 %v1143_v43  ;;  %v1144_v49 = vunpack.i.l.bf16 %v1143_v43 }
  0x82   :  { %982 = vmatmul.mubr.msk.f32.vlgmr.msra.gmra.mrb[0].mxu1 %vm68_vm0, %v18_v37  ;;  %1070 = vmatprep.subr.msk.bf16.mxu0 %vm1069_vm13, %v1068_v40 }
  0x83   :  { %1073 = vmatpush3.bf16.msk.msra.mxu0 %vm1069_vm13, %v1068_v40  ;;  %1051 = vmatpush3.bf16.msk.msra.mxu1 %vm1231_vm11, %v1046_v27  ;;  %v239_v51 = vsel %vm237_vm14, 0.0, %v1140_v44  ;;  %v238_v52 = vsel %vm237_vm14, 0.0, %v1139_v45  ;;  %v710_v53 = vsel %vm708_vm15, %v1145_v48, 0.0  ;;  %v709_v54 = vsel %vm708_vm15, %v1144_v49, 0.0  ;;  %vm807_vm11 = vmand %vm1214_vm7, %vm1221_vm9 }
  0x84   :  { %v1052_v56 = vpack.c.bf16 %v239_v51, %v238_v52  ;;  %988 = vmatprep.mubr.msk.f32.mxu1 %vm68_vm0, %v15_v46  ;;  %1076 = vmatprep.subr.msk.bf16.mxu0 %vm1272_vm4, %v1074_v41  ;;  %v1080_v57 = vpack.c.bf16 %v710_v53, %v709_v54  ;;  %v1148_v59 = vpop.permute.xlu0 %1147  ;;  %v1153_v60 = vpop.permute.xlu1 %1152  ;;  %vm1087_vm9 = vmpackc.low %vm807_vm11, %vm807_vm11 }
  0x85   :  { %v1150_v61 = vunpack.i.h.bf16 %v1148_v59  ;;  %v1149_v62 = vunpack.i.l.bf16 %v1148_v59  ;;  %v1155_v63 = vunpack.i.h.bf16 %v1153_v60  ;;  %v1154_v0 = vunpack.i.l.bf16 %v1153_v60 }
  0x86   :  { %1017 = vmatmul.mubr.msk.f32.vlgmr.msra.gmra.mrb[0].mxu0 %vm68_vm0, %v26_v50  ;;  %1054 = vmatprep.subr.msk.bf16.mxu1 %vm1302_vm5, %v1052_v56 }
  0x87   :  { %1079 = vmatpush3.bf16.msk.msra.mxu0 %vm1272_vm4, %v1074_v41  ;;  %1023 = vmatprep.mubr.msk.f32.mxu0 %vm68_vm0, %v27_v58  ;;  %v337_v2 = vsel %vm335_vm6, 0.0, %v1150_v61  ;;  %v336_v3 = vsel %vm335_vm6, 0.0, %v1149_v62  ;;  %v806_v6 = vsel %vm804_vm8, %v1155_v63, 0.0  ;;  %v805_v7 = vsel %vm804_vm8, %v1154_v0, 0.0 }
  0x88   :  { %v1058_v4 = vpack.c.bf16 %v337_v2, %v336_v3  ;;  %1082 = vmatprep.subr.msk.bf16.mxu0 %vm1081_vm2, %v1080_v57  ;;  %v1086_v9 = vpack.c.bf16 %v806_v6, %v805_v7 }
  0x8a   :  { %989 = vmatmul.mubr.msk.f32.vlgmr.msra.gmra.mrb[0].mxu1 %vm68_vm0, %v16_v1 }
  0x8b   :  { %1057 = vmatpush3.bf16.msk.msra.mxu1 %vm1302_vm5, %v1052_v56  ;;  %995 = vmatprep.mubr.msk.f32.mxu1 %vm68_vm0, %v19_v5 }
  0x8c   :  { %1060 = vmatprep.subr.msk.bf16.mxu1 %vm1059_vm10, %v1058_v4 }
  0x8e   :  { %1024 = vmatmul.mubr.msk.f32.vlgmr.msra.gmra.mrb[0].mxu0 %vm68_vm0, %v28_v8 }
  0x8f   :  { %1085 = vmatpush3.bf16.msk.msra.mxu0 %vm1081_vm2, %v1080_v57  ;;  %1030 = vmatprep.mubr.msk.f32.mxu0 %vm68_vm0, %v29_v10 }
  0x90   :  { %1088 = vmatprep.subr.msk.bf16.mxu0 %vm1087_vm9, %v1086_v9 }
  0x92   :  { %996 = vmatmul.mubr.msk.f32.vlgmr.msra.gmra.mrb[0].mxu1 %vm68_vm0, %v20_v11 }
  0x93   :  { %1063 = vmatpush3.bf16.msk.msra.mxu1 %vm1059_vm10, %v1058_v4  ;;  %1002 = vmatprep.mubr.msk.f32.mxu1 %vm68_vm0, %v21_v13 }
  0x96   :  { %1031 = vmatmul.mubr.msk.f32.vlgmr.msra.gmra.mrb[0].mxu0 %vm68_vm0, %v30_v14 }
  0x97   :  { %1091 = vmatpush3.bf16.msk.msra.mxu0 %vm1087_vm9, %v1086_v9  ;;  %1037 = vmatprep.mubr.msk.f32.mxu0 %vm68_vm0, %v31_v15 }
  0x9a   :  { %1003 = vmatmul.mubr.msk.f32.vlgmr.msra.gmra.mrb[0].mxu1 %vm68_vm0, %v22_v16 }
  0x9e   :  { %1038 = vmatmul.mubr.msk.f32.vlgmr.msra.gmra.mrb[0].mxu0 %vm68_vm0, %v32_v12 }
 0x16d   :  { %v1004_v17 = vpop.f32.mrb[0].mxu1 }
 0x16e   :  { %v414_v18 = vpop.f32.mrb[1].mxu1 }
 0x171   :  { %v1039_v19 = vpop.f32.mrb[0].mxu0 }
 0x172   :  { %v1092_v20 = vadd.f32 %v1039_v19, %v1004_v17  ;;  %v884_v21 = vpop.f32.mrb[1].mxu0 }
 0x173   :  { %v1093_v22 = vadd.f32 %v884_v21, %v414_v18 }
 0x174   :  { %1156 = vtanh.f32 %v1092_v20 }
 0x175   :  { %1158 = vtanh.f32 %v1093_v22 }
 0x17e   :  { %v1157_v23 = vpop.eup %1156 }
 0x17f   :  { %v1159_v24 = vpop.eup %1158  ;;  %898 = vst [vmem:[%s1398_s2 + $0x8] sm:$0xf] %v1157_v23 }
 0x180   :  { %897 = vst [vmem:[%s1398_s2] sm:$0xff] %v1159_v24 }

// kernel: g_forward.2
= control target key start
LH: loop header
LB: loop body
LE: loop exit
PB: predicated region body
PF: predicated region fallthrough
CT: control target
= control target key end

     0   :  { %vm139_vm0 = vcmask 261120   ;;  %vm298_vm2 = vcmask 1043456   ;;  %vm517_vm3 = vcmask 1042432   ;;  %vm261_vm8 = vcmask 1044480   ;;  %s2010_s23 = smov 112   ;;  %s2011_s24 = smov 80   ;;  %s2690_s1 = inlined_call_operand.vmem [shape: f32[256,32], index: 1, kind: input, shape index: {}]   ;;  %s2691_s0 = inlined_call_operand.vmem [shape: f32[32,256], index: 0, kind: input, shape index: {}]   ;;  %s2692_s2 = inlined_call_operand.vmem [shape: f32[9,32,64], index: 2, kind: input, shape index: {}]   ;;  %s2693_s3 = inlined_call_operand.vmem [shape: bf16[32,64], index: 3, kind: output, shape index: {}]  }
   0x1   :  { %v38_v0 = vld [vmem:[%s2690_s1 + $0x80] sm:$0xff]  ;;  %v39_v1 = vld [vmem:[%s2690_s1 + $0x88] sm:$0xff]  ;;  %v40_v5 = vld [vmem:[%s2690_s1 + $0x90] sm:$0xff]  ;;  %vm651_vm9 = vcmask 1040384   ;;  %vm874_vm13 = vcmask 1046528   ;;  %s2012_s25 = smov 16  }
   0x2   :  { %v22_v2 = vld [vmem:[%s2690_s1] sm:$0xff]  ;;  %v1859_v3 = vpack.c.bf16 %v39_v1, %v38_v0  ;;  %v23_v4 = vld [vmem:[%s2690_s1 + $0x8] sm:$0xff]  ;;  %v41_v6 = vld [vmem:[%s2690_s1 + $0x98] sm:$0xff]  ;;  %s2013_s26 = smov 32   ;;  %s2014_s27 = smov 48  }
   0x3   :  { %v1861_v7 = vpack.c.bf16 %v23_v4, %v22_v2  ;;  %v1863_v8 = vpack.c.bf16 %v41_v6, %v40_v5  ;;  %v24_v9 = vld [vmem:[%s2690_s1 + $0x10] sm:$0xff]  ;;  %v25_v10 = vld [vmem:[%s2690_s1 + $0x18] sm:$0xff]  ;;  %v42_v11 = vld [vmem:[%s2690_s1 + $0xa0] sm:$0xff] }
   0x4   :  { %1860 = vmatprep.subr.bf16.mxu0 %v1859_v3  ;;  %v43_v12 = vld [vmem:[%s2690_s1 + $0xa8] sm:$0xff]  ;;  %v1865_v13 = vpack.c.bf16 %v25_v10, %v24_v9  ;;  %v26_v15 = vld [vmem:[%s2690_s1 + $0x20] sm:$0xff]  ;;  %v44_v17 = vld [vmem:[%s2690_s1 + $0xb0] sm:$0xff] }
   0x5   :  { %1862 = vmatpush3.bf16.msra.mxu0 %v1861_v7  ;;  %v1867_v14 = vpack.c.bf16 %v43_v12, %v42_v11  ;;  %v27_v16 = vld [vmem:[%s2690_s1 + $0x28] sm:$0xff]  ;;  %v45_v18 = vld [vmem:[%s2690_s1 + $0xb8] sm:$0xff]  ;;  %v28_v21 = vld [vmem:[%s2690_s1 + $0x30] sm:$0xff] }
   0x6   :  { %1864 = vmatprep.subr.bf16.mxu0 %v1863_v8  ;;  %v1869_v19 = vpack.c.bf16 %v27_v16, %v26_v15  ;;  %v1871_v20 = vpack.c.bf16 %v45_v18, %v44_v17  ;;  %v29_v22 = vld [vmem:[%s2690_s1 + $0x38] sm:$0xff]  ;;  %v46_v23 = vld [vmem:[%s2690_s1 + $0xc0] sm:$0xff]  ;;  %v47_v24 = vld [vmem:[%s2690_s1 + $0xc8] sm:$0xff] }
   0x7   :  { %v15_v25 = vld [vmem:[%s2691_s0 + $0x8] sm:$0xff]  ;;  %v1873_v26 = vpack.c.bf16 %v29_v22, %v28_v21  ;;  %v1875_v27 = vpack.c.bf16 %v47_v24, %v46_v23  ;;  %v30_v28 = vld [vmem:[%s2690_s1 + $0x40] sm:$0xff]  ;;  %v48_v30 = vld [vmem:[%s2690_s1 + $0xd0] sm:$0xff] }
   0x8   :  { %118 = vmatprep.mubr.f32.mxu0 %v15_v25  ;;  %v31_v29 = vld [vmem:[%s2690_s1 + $0x48] sm:$0xff]  ;;  %v49_v31 = vld [vmem:[%s2690_s1 + $0xd8] sm:$0xff]  ;;  %v32_v34 = vld [vmem:[%s2690_s1 + $0x50] sm:$0xff] }
   0x9   :  { %1866 = vmatpush3.bf16.msra.mxu0 %v1865_v13  ;;  %v1877_v32 = vpack.c.bf16 %v31_v29, %v30_v28  ;;  %v1879_v33 = vpack.c.bf16 %v49_v31, %v48_v30  ;;  %v33_v35 = vld [vmem:[%s2690_s1 + $0x58] sm:$0xff]  ;;  %v50_v36 = vld [vmem:[%s2690_s1 + $0xe0] sm:$0xff]  ;;  %v51_v37 = vld [vmem:[%s2690_s1 + $0xe8] sm:$0xff] }
   0xa   :  { %1868 = vmatprep.subr.bf16.mxu0 %v1867_v14  ;;  %v1881_v38 = vpack.c.bf16 %v33_v35, %v32_v34  ;;  %v1883_v39 = vpack.c.bf16 %v51_v37, %v50_v36  ;;  %v34_v40 = vld [vmem:[%s2690_s1 + $0x60] sm:$0xff]  ;;  %v35_v41 = vld [vmem:[%s2690_s1 + $0x68] sm:$0xff]  ;;  %v52_v42 = vld [vmem:[%s2690_s1 + $0xf0] sm:$0xff] }
   0xb   :  { %v53_v43 = vld [vmem:[%s2690_s1 + $0xf8] sm:$0xff]  ;;  %v1885_v44 = vpack.c.bf16 %v35_v41, %v34_v40  ;;  %v36_v46 = vld [vmem:[%s2690_s1 + $0x70] sm:$0xff]  ;;  %v14_v49 = vld [vmem:[%s2691_s0] sm:$0xff] }
   0xc   :  { %v1887_v45 = vpack.c.bf16 %v53_v43, %v52_v42  ;;  %v37_v47 = vld [vmem:[%s2690_s1 + $0x78] sm:$0xff]  ;;  %v16_v51 = vld [vmem:[%s2691_s0 + $0x10] sm:$0xff]  ;;  %v19_v52 = vld [vmem:[%s2691_s0 + $0x28] sm:$0xff] }
   0xd   :  { %1870 = vmatpush3.bf16.msra.mxu0 %v1869_v19  ;;  %v1889_v48 = vpack.c.bf16 %v37_v47, %v36_v46  ;;  %v17_v50 = vld [vmem:[%s2691_s0 + $0x18] sm:$0xff]  ;;  %v18_v53 = vld [vmem:[%s2691_s0 + $0x20] sm:$0xff]  ;;  %v20_v55 = vld [vmem:[%s2691_s0 + $0x30] sm:$0xff] }
   0xe   :  { %1872 = vmatprep.subr.bf16.mxu0 %v1871_v20  ;;  %v21_v54 = vld [vmem:[%s2691_s0 + $0x38] sm:$0xff]  ;;  %v212_v56 = vld [vmem:[%s2692_s2 + $0x20] sm:$0xff]  ;;  %v213_v57 = vld [vmem:[%s2692_s2 + $0x28] sm:$0xff] }
   0xf   :  { %v216_v58 = vld [vmem:[%s2692_s2 + $0x40] sm:$0xff]  ;;  %v1891_v59 = vpack.c.bf16 %v213_v57, %v212_v56  ;;  %v217_v60 = vld [vmem:[%s2692_s2 + $0x48] sm:$0xff]  ;;  %v214_v62 = vld [vmem:[%s2692_s2 + $0x30] sm:$0xff] }
  0x10   :  { %v1907_v61 = vpack.c.bf16 %v217_v60, %v216_v58  ;;  %v215_v63 = vld [vmem:[%s2692_s2 + $0x38] sm:$0xff]  ;;  %v218_v0 = vld [vmem:[%s2692_s2 + $0x50] sm:$0xff]  ;;  %v220_v4 = vld [vmem:[%s2692_s2 + $0x60] sm:$0xff] }
  0x11   :  { %1874 = vmatpush3.bf16.msra.mxu0 %v1873_v26  ;;  %v1895_v1 = vpack.c.bf16 %v215_v63, %v214_v62  ;;  %v219_v2 = vld [vmem:[%s2692_s2 + $0x58] sm:$0xff]  ;;  %v221_v5 = vld [vmem:[%s2692_s2 + $0x68] sm:$0xff]  ;;  %v208_v6 = vld [vmem:[%s2692_s2] sm:$0xff] }
  0x12   :  { %1876 = vmatprep.subr.bf16.mxu0 %v1875_v27  ;;  %1908 = vmatprep.subr.bf16.mxu1 %v1907_v61  ;;  %v1911_v3 = vpack.c.bf16 %v219_v2, %v218_v0  ;;  %v2188_v7 = vpack.c.bf16 %v221_v5, %v220_v4  ;;  %v209_v8 = vld [vmem:[%s2692_s2 + $0x8] sm:$0xff]  ;;  %v244_v2 = vlaneseq }
  0x13   :  { %1910 = vmatpush3.bf16.msra.mxu1 %v1907_v61  ;;  %v2193_v9 = vpack.c.bf16 %v209_v8, %v208_v6 }
  0x14   :  { %1912 = vmatprep.subr.bf16.mxu1 %v1911_v3  ;;  %v2213_v6 = vshrl.u32 %v244_v2, 7 }
  0x15   :  { %1878 = vmatpush3.bf16.msra.mxu0 %v1877_v32 }
  0x16   :  { %1880 = vmatprep.subr.bf16.mxu0 %v1879_v33 }
  0x17   :  { %1914 = vmatpush3.bf16.msra.mxu1 %v1911_v3 }
  0x18   :  { %1916 = vmatprep.subr.bf16.mxu1 %v2188_v7 }
  0x19   :  { %1882 = vmatpush3.bf16.msra.mxu0 %v1881_v38 }
  0x1a   :  { %1884 = vmatprep.subr.bf16.mxu0 %v1883_v39 }
  0x1d   :  { %1886 = vmatpush3.bf16.msra.mxu0 %v1885_v44 }
  0x1e   :  { %1888 = vmatprep.subr.bf16.mxu0 %v1887_v45 }
  0x21   :  { %1890 = vmatpush3.bf16.msra.mxu0 %v1889_v48 }
  0x22   :  { %1892 = vmatprep.subr.bf16.mxu0 %v1891_v59 }
  0x24   :  { %119 = vmatmul.mubr.f32.vlgmr.msra.gmra.mrb[0].mxu0 %v14_v49 }
  0x25   :  { %123 = vmatprep.mubr.f32.mxu0 %v17_v50  ;;  %1894 = vmatpush3.bf16.msra.mxu0 %v1891_v59 }
  0x26   :  { %1896 = vmatprep.subr.bf16.mxu0 %v1895_v1 }
  0x28   :  { %124 = vmatmul.mubr.f32.gmra.mrb[2].mxu0 %v16_v51 }
  0x29   :  { %128 = vmatprep.mubr.f32.mxu0 %v19_v52  ;;  %1898 = vmatpush3.bf16.msra.mxu0 %v1895_v1 }
  0x2a   :  { %1900 = vmatprep.subr.bf16.mxu0 %v2193_v9 }
  0x2c   :  { %129 = vmatmul.mubr.f32.gmra.mrb[4].mxu0 %v18_v53 }
  0x2d   :  { %133 = vmatprep.mubr.f32.mxu0 %v21_v54 }
  0x30   :  { %134 = vmatmul.mubr.f32.gmra.mrb[6].mxu0 %v20_v55 }
  0xf7   :  { %v1649_v10 = vpop.f32.mrb[0].mxu0 }
  0xf8   :  { %v1650_v11 = vpop.f32.mrb[1].mxu0 }
  0xf9   :  { %v1651_v12 = vadd.f32 %v1650_v11, %v1649_v10  ;;  %v2216_v11 = vadd.s32 8, %v2213_v6 }
  0xfb   :  { %v1652_v13 = vpop.f32.mrb[2].mxu0  ;;  %v140_v16 = vsel %vm139_vm0, %v1651_v12, 0.0 }
  0xfc   :  { %v1653_v14 = vpop.f32.mrb[3].mxu0 }
  0xfd   :  { %v1654_v15 = vadd.f32 %v1653_v14, %v1652_v13  ;;  %v249_v13 = vand.u32 15, %v2213_v6  ;;  %v2220_v14 = vadd.s32 16, %v2213_v6 }
  0xff   :  { %v141_v17 = vsel %vm139_vm0, %v1654_v15, 0.0  ;;  %v1655_v18 = vpop.f32.mrb[4].mxu0  ;;  %vm2224_vm1 = vcmp.ge.s32.totalorder %v249_v13, 4 }
 0x100   :  { %v142_v19 = vadd.f32 %v141_v17, %v140_v16  ;;  %v1656_v20 = vpop.f32.mrb[5].mxu0  ;;  %v254_v16 = vand.u32 3, %v2216_v11 }
 0x101   :  { %v1657_v21 = vadd.f32 %v1656_v20, %v1655_v18 }
 0x102   :  { %v143_v22 = vrot.slane %v142_v19, 4  ;;  %vm2238_vm5 = vcmp.lt.s32.totalorder %v254_v16, 3 }
 0x103   :  { %v1658_v23 = vpop.f32.mrb[6].mxu0  ;;  %v174_v28 = vsel %vm139_vm0, %v1657_v21, 0.0 }
 0x104   :  { %v144_v24 = vadd.f32 %v143_v22, %v142_v19  ;;  %v1659_v25 = vpop.f32.mrb[7].mxu0  ;;  %v2230_v22 = vadd.s32 24, %v2213_v6 }
 0x105   :  { %v1660_v26 = vadd.f32 %v1659_v25, %v1658_v23  ;;  %v222_v25 = vld [vmem:[%s2692_s2 + $0x70] sm:$0xff] }
 0x106   :  { %v145_v27 = vrot.slane %v144_v24, 2 }
 0x107   :  { %v175_v29 = vsel %vm139_vm0, %v1660_v26, 0.0 }
 0x108   :  { %v146_v30 = vadd.f32 %v145_v27, %v144_v24  ;;  %v176_v31 = vadd.f32 %v175_v29, %v174_v28  ;;  %v255_v28 = vand.u32 3, %v2220_v14  ;;  %v223_v29 = vld [vmem:[%s2692_s2 + $0x78] sm:$0xff] }
 0x10a   :  { %v147_v32 = vrot.slane %v146_v30, 1  ;;  %v177_v33 = vrot.slane %v176_v31, 4  ;;  %vm2308_vm14 = vcmp.lt.s32.totalorder %v255_v28, 3 }
 0x10c   :  { %v148_v34 = vadd.f32 %v147_v32, %v146_v30  ;;  %v178_v35 = vadd.f32 %v177_v33, %v176_v31  ;;  %v210_v30 = vld [vmem:[%s2692_s2 + $0x10] sm:$0xff]  ;;  %v211_v31 = vld [vmem:[%s2692_s2 + $0x18] sm:$0xff] }
 0x10e   :  { %v149_v36 = vmul.f32 0.0625, %v148_v34  ;;  %v179_v37 = vrot.slane %v178_v35, 2 }
 0x110   :  { %v150_v38 = vsub.f32 %v1651_v12, %v149_v36  ;;  %v151_v39 = vsub.f32 %v1654_v15, %v149_v36  ;;  %v180_v40 = vadd.f32 %v179_v37, %v178_v35  ;;  %v253_v15 = vand.u32 3, %v2213_v6  ;;  %v241_v36 = vld [vmem:[%s2692_s2 + $0x108] sm:$0xff] }
 0x111   :  { %v256_v35 = vand.u32 3, %v2230_v22 }
 0x112   :  { %v152_v41 = vmul.f32 %v150_v38, %v150_v38  ;;  %v153_v42 = vmul.f32 %v151_v39, %v151_v39  ;;  %v181_v43 = vrot.slane %v180_v40, 1  ;;  %vm2232_vm4 = vcmp.lt.s32.totalorder %v253_v15, 3 }
 0x113   :  { %vm2264_vm11 = vcmp.ge.s32.totalorder %v253_v15, 1  ;;  %vm534_vm12 = vmand %vm2224_vm1, %vm2232_vm4 }
 0x114   :  { %v154_v44 = vsel %vm139_vm0, %v152_v41, 0.0  ;;  %v155_v45 = vsel %vm139_vm0, %v153_v42, 0.0  ;;  %v182_v46 = vadd.f32 %v181_v43, %v180_v40  ;;  %v1919_v41 = vpack.c.bf16 %v223_v29, %v222_v25 }
 0x115   :  { %v156_v47 = vadd.f32 %v155_v45, %v154_v44  ;;  %v1903_v42 = vpack.c.bf16 %v211_v31, %v210_v30  ;;  %v242_v30 = vld [vmem:[%s2692_s2 + $0x110] sm:$0xff] }
 0x116   :  { %v183_v48 = vmul.f32 0.0625, %v182_v46 }
 0x117   :  { %v157_v49 = vrot.slane %v156_v47, 4 }
 0x118   :  { %v2203_v50 = vsub.f32 %v1657_v21, %v183_v48  ;;  %v2205_v51 = vsub.f32 %v1660_v26, %v183_v48  ;;  %v251_v21 = vand.u32 15, %v2220_v14 }
 0x119   :  { %v158_v52 = vadd.f32 %v157_v49, %v156_v47 }
 0x11a   :  { %v186_v53 = vmul.f32 %v2203_v50, %v2203_v50  ;;  %v187_v54 = vmul.f32 %v2205_v51, %v2205_v51  ;;  %vm2259_vm10 = vcmp.ge.s32.totalorder %v251_v21, 4 }
 0x11b   :  { %v159_v55 = vrot.slane %v158_v52, 2 }
 0x11c   :  { %v188_v56 = vsel %vm139_vm0, %v186_v53, 0.0  ;;  %v189_v57 = vsel %vm139_vm0, %v187_v54, 0.0 }
 0x11d   :  { %v160_v58 = vadd.f32 %v159_v55, %v158_v52  ;;  %v190_v59 = vadd.f32 %v189_v57, %v188_v56  ;;  %v224_v56 = vld [vmem:[%s2692_s2 + $0x80] sm:$0xff]  ;;  %v225_v57 = vld [vmem:[%s2692_s2 + $0x88] sm:$0xff] }
 0x11f   :  { %v161_v60 = vrot.slane %v160_v58, 1  ;;  %v191_v61 = vrot.slane %v190_v59, 4 }
 0x121   :  { %v162_v62 = vadd.f32 %v161_v60, %v160_v58  ;;  %v192_v63 = vadd.f32 %v191_v61, %v190_v59 }
 0x123   :  { %v163_v0 = vmul.f32 0.0625, %v162_v62  ;;  %v193_v1 = vrot.slane %v192_v63, 2 }
 0x125   :  { %v164_v3 = vadd.f32 1e-08, %v163_v0  ;;  %v194_v4 = vadd.f32 %v193_v1, %v192_v63  ;;  %v2328_v0 = vpack.c.bf16 %v225_v57, %v224_v56  ;;  %v229_v56 = vld [vmem:[%s2692_s2 + $0xa8] sm:$0xff] }
 0x127   :  { %2001 = vrsqrt.f32 %v164_v3  ;;  %v195_v5 = vrot.slane %v194_v4, 1 }
 0x129   :  { %v196_v8 = vadd.f32 %v195_v5, %v194_v4 }
 0x12b   :  { %v197_v10 = vmul.f32 0.0625, %v196_v8 }
 0x12d   :  { %v198_v12 = vadd.f32 1e-08, %v197_v10 }
 0x12f   :  { %2003 = vrsqrt.f32 %v198_v12 }
 0x131   :  { %v2002_v17 = vpop.eup %2001 }
 0x132   :  { %v166_v19 = vmul.f32 %v2002_v17, %v150_v38  ;;  %v167_v20 = vmul.f32 %v2002_v17, %v151_v39 }
 0x134   :  { %vm168_vm6 = vcmp.gt.f32.partialorder %v166_v19, 0.0  ;;  %vm169_vm7 = vcmp.gt.f32.partialorder %v167_v20, 0.0  ;;  %v170_v26 = vmul.f32 0.2, %v166_v19  ;;  %v171_v27 = vmul.f32 0.2, %v167_v20 }
 0x136   :  { %v2255_v32 = vsel %vm168_vm6, %v166_v19, %v170_v26  ;;  %v2257_v33 = vsel %vm169_vm7, %v167_v20, %v171_v27  ;;  %vm2324_vm7 = vcmp.lt.s32.totalorder %v256_v35, 3 }
 0x137   :  { %v299_v37 = vrot.slane %v2255_v32, 4  ;;  %v518_v38 = vrot.slane %v2255_v32, 5  ;;  %v300_v39 = vrot.slane %v2257_v33, 4  ;;  %v519_v40 = vrot.slane %v2257_v33, 5 }
 0x138   :  { %v262_v43 = vrot.slane %v2255_v32, 3  ;;  %v263_v44 = vrot.slane %v2257_v33, 3  ;;  %v652_v58 = vrot.slane %v2255_v32, 7  ;;  %v876_v62 = vrot.slane %v2257_v33, 1 }
 0x139   :  { %v2004_v45 = vpop.eup %2003  ;;  %v310_v46 = vsel %vm298_vm2, 0.0, %v299_v37  ;;  %v529_v47 = vsel %vm517_vm3, 0.0, %v518_v38  ;;  %v2281_v48 = vsel %vm298_vm2, %v299_v37, %v300_v39  ;;  %v2284_v49 = vsel %vm517_vm3, %v518_v38, %v519_v40 }
 0x13a   :  { %v200_v52 = vmul.f32 %v2004_v45, %v2203_v50  ;;  %v201_v53 = vmul.f32 %v2004_v45, %v2205_v51  ;;  %v319_v54 = vsel %vm2224_vm1, %v310_v46, 0.0  ;;  %v546_v55 = vsel %vm534_vm12, %v529_v47, 0.0  ;;  %vm536_vm12 = vmand %vm2259_vm10, %vm2308_vm14 }
 0x13b   :  { %1741 = vmatprep.mubr.msk.f32.mxu0 %vm139_vm0, %v319_v54  ;;  %1769 = vmatprep.mubr.msk.f32.mxu1 %vm139_vm0, %v546_v55  ;;  %v547_v50 = vsel %vm2238_vm5, %v2284_v49, 0.0  ;;  %v2314_v59 = vsel %vm261_vm8, %v262_v43, %v263_v44  ;;  %v653_v1 = vrot.slane %v2257_v33, 7  ;;  %v663_v29 = vsel %vm651_vm9, 0.0, %v652_v58  ;;  %v228_v55 = vld [vmem:[%s2692_s2 + $0xa0] sm:$0xff] }
 0x13c   :  { %vm202_vm15 = vcmp.gt.f32.partialorder %v200_v52, 0.0  ;;  %vm203_vm6 = vcmp.gt.f32.partialorder %v201_v53, 0.0  ;;  %v204_v60 = vmul.f32 0.2, %v200_v52  ;;  %v205_v61 = vmul.f32 0.2, %v201_v53  ;;  %1742 = vmatmul.mubr.msk.f32.vlgmr.msra.gmra.mrb[8].mxu0 %vm139_vm0, %v2281_v48  ;;  %1770 = vmatmul.mubr.msk.f32.vlgmr.msra.gmra.mrb[0].mxu1 %vm139_vm0, %v547_v50 }
 0x13d   :  { %1918 = vmatpush3.bf16.msra.mxu1 %v2188_v7  ;;  %1902 = vmatpush3.bf16.msra.mxu0 %v2193_v9  ;;  %v273_v7 = vsel %vm261_vm8, 0.0, %v262_v43  ;;  %v875_v9 = vrot.slane %v2255_v32, 1  ;;  %v654_v13 = vsel %vm651_vm9, %v652_v58, %v653_v1  ;;  %v1931_v58 = vpack.c.bf16 %v229_v56, %v228_v55 }
 0x13e   :  { %v2331_v2 = vsel %vm202_vm15, %v200_v52, %v204_v60  ;;  %v2333_v3 = vsel %vm203_vm6, %v201_v53, %v205_v61  ;;  %1920 = vmatprep.subr.bf16.mxu1 %v1919_v41  ;;  %1904 = vmatprep.subr.bf16.mxu0 %v1903_v42  ;;  %vm282_vm15 = vmand %vm2224_vm1, %vm2264_vm11  ;;  %vm2375_vm6 = vcmp.ge.s32.totalorder %v255_v28, 1  ;;  %vm2391_vm1 = vcmp.ge.s32.totalorder %v254_v16, 1  ;;  %v227_v16 = vld [vmem:[%s2692_s2 + $0x98] sm:$0xff]  ;;  %v230_v61 = vld [vmem:[%s2692_s2 + $0xb0] sm:$0xff] }
 0x13f   :  { %v878_v4 = vrot.slane %v2331_v2, 1  ;;  %v302_v5 = vrot.slane %v2331_v2, 4  ;;  %v521_v8 = vrot.slane %v2331_v2, 5  ;;  %v304_v10 = vrot.slane %v2333_v3, 4 }
 0x140   :  { %v523_v12 = vrot.slane %v2333_v3, 5  ;;  %v265_v15 = vrot.slane %v2331_v2, 3  ;;  %v655_v17 = vrot.slane %v2331_v2, 7  ;;  %v294_v37 = vsel %vm282_vm15, %v273_v7, 0.0  ;;  %v233_v7 = vld [vmem:[%s2692_s2 + $0xc8] sm:$0xff] }
 0x141   :  { %v2350_v19 = vsel %vm874_vm13, %v876_v62, %v878_v4  ;;  %v2353_v20 = vsel %vm298_vm2, %v300_v39, %v302_v5  ;;  %v2356_v21 = vsel %vm517_vm3, %v519_v40, %v521_v8  ;;  %v2361_v25 = vsel %vm298_vm2, %v302_v5, %v304_v10  ;;  %1922 = vmatpush3.bf16.msra.mxu1 %v1919_v41  ;;  %v226_v39 = vld [vmem:[%s2692_s2 + $0x90] sm:$0xff] }
 0x142   :  { %v321_v26 = vsel %vm2259_vm10, %v2353_v20, 0.0  ;;  %v548_v27 = vsel %vm536_vm12, %v2356_v21, 0.0  ;;  %1906 = vmatpush3.bf16.msra.mxu0 %v1903_v42  ;;  %1924 = vmatprep.subr.bf16.mxu1 %v2328_v0  ;;  %v2384_v18 = vsel %vm517_vm3, %v521_v8, %v523_v12  ;;  %v2387_v31 = vsel %vm261_vm8, %v263_v44, %v265_v15  ;;  %vm284_vm12 = vmand %vm2259_vm10, %vm2375_vm6 }
 0x143   :  { %1744 = vmatprep.mubr.msk.f32.mxu0 %vm139_vm0, %v321_v26  ;;  %1772 = vmatprep.mubr.msk.f32.mxu1 %vm139_vm0, %v548_v27  ;;  %v549_v28 = vsel %vm2324_vm7, %v2384_v18, 0.0  ;;  %v656_v38 = vsel %vm651_vm9, %v653_v1, %v655_v17  ;;  %v672_v40 = vsel %vm2264_vm11, %v663_v29, 0.0  ;;  %v267_v41 = vrot.slane %v2333_v3, 3  ;;  %v232_v1 = vld [vmem:[%s2692_s2 + $0xc0] sm:$0xff] }
 0x144   :  { %1745 = vmatmul.mubr.msk.f32.gmra.mrb[10].mxu0 %vm139_vm0, %v2361_v25  ;;  %1773 = vmatmul.mubr.msk.f32.gmra.mrb[2].mxu1 %vm139_vm0, %v549_v28  ;;  %v657_v42 = vrot.slane %v2333_v3, 7  ;;  %v877_v43 = vsel %vm874_vm13, %v875_v9, %v876_v62  ;;  %v880_v44 = vrot.slane %v2333_v3, 1  ;;  %v295_v45 = vsel %vm2391_vm1, %v2314_v59, 0.0  ;;  %v231_v62 = vld [vmem:[%s2692_s2 + $0xb8] sm:$0xff]  ;;  %v238_v28 = vld [vmem:[%s2692_s2 + $0xf0] sm:$0xff] }
 0x145   :  { %1755 = vmatprep.mubr.msk.f32.mxu0 %vm139_vm0, %v294_v37  ;;  %1783 = vmatprep.mubr.msk.f32.mxu1 %vm139_vm0, %v672_v40  ;;  %v1927_v46 = vpack.c.bf16 %v227_v16, %v226_v39  ;;  %v2426_v34 = vsel %vm261_vm8, %v265_v15, %v267_v41  ;;  %v673_v52 = vsel %vm2391_vm1, %v654_v13, 0.0  ;;  %v296_v53 = vsel %vm284_vm12, %v2387_v31, 0.0  ;;  %v236_v13 = vld [vmem:[%s2692_s2 + $0xe0] sm:$0xff]  ;;  %v237_v15 = vld [vmem:[%s2692_s2 + $0xe8] sm:$0xff]  ;;  %v239_v37 = vld [vmem:[%s2692_s2 + $0xf8] sm:$0xff] }
 0x146   :  { %v658_v47 = vsel %vm651_vm9, %v655_v17, %v657_v42  ;;  %vm2435_vm10 = vcmp.ge.s32.totalorder %v256_v35, 1  ;;  %v881_v57 = vsel %vm874_vm13, %v878_v4, %v880_v44  ;;  %v674_v35 = vsel %vm2375_vm6, %v656_v38, 0.0  ;;  %v235_v4 = vld [vmem:[%s2692_s2 + $0xd8] sm:$0xff]  ;;  %v240_v16 = vld [vmem:[%s2692_s2 + $0x100] sm:$0xff] }
 0x147   :  { %v297_v50 = vsel %vm2435_vm10, %v2426_v34, 0.0  ;;  %v675_v60 = vsel %vm2435_vm10, %v658_v47, 0.0  ;;  %v1939_v9 = vpack.c.bf16 %v233_v7, %v232_v1  ;;  %v250_v5 = vand.u32 15, %v2216_v11 }
 0x148   :  { %1756 = vmatmul.mubr.msk.f32.vlgmr.msra.gmra.mrb[8].mxu0 %vm139_vm0, %v295_v45  ;;  %1784 = vmatmul.mubr.msk.f32.vlgmr.msra.gmra.mrb[0].mxu1 %vm139_vm0, %v673_v52  ;;  %v896_v8 = vsel %vm2238_vm5, %v2350_v19, 0.0  ;;  %v897_v11 = vsel %vm2308_vm14, %v881_v57, 0.0  ;;  %v886_v17 = vsel %vm874_vm13, %v880_v44, 0.0  ;;  %v252_v19 = vand.u32 15, %v2230_v22 }
 0x149   :  { %1758 = vmatprep.mubr.msk.f32.mxu0 %vm139_vm0, %v296_v53  ;;  %1926 = vmatpush3.bf16.msra.mxu1 %v2328_v0  ;;  %v1935_v0 = vpack.c.bf16 %v231_v62, %v230_v61  ;;  %vm2502_vm9 = vcmp.lt.s32.totalorder %v250_v5, 12  ;;  %v1947_v27 = vpack.c.bf16 %v237_v15, %v236_v13  ;;  %v898_v29 = vsel %vm2324_vm7, %v886_v17, 0.0 }
 0x14a   :  { %1786 = vmatprep.mubr.msk.f32.mxu1 %vm139_vm0, %v674_v35  ;;  %1928 = vmatprep.subr.bf16.mxu1 %v1927_v46  ;;  %vm1007_vm13 = vmand %vm2502_vm9, %vm2391_vm1  ;;  %v1018_v22 = vsel %vm2264_vm11, %v2314_v59, 0.0  ;;  %vm2525_vm15 = vcmp.lt.s32.totalorder %v252_v19, 12  ;;  %v1951_v39 = vpack.c.bf16 %v239_v37, %v238_v28  ;;  %v1020_v59 = vsel %vm2375_vm6, %v2426_v34, 0.0 }
 0x14b   :  { %v1019_v14 = vsel %vm1007_vm13, %v2387_v31, 0.0  ;;  %v1001_v40 = vsel %vm261_vm8, %v267_v41, 0.0  ;;  %vm1009_vm11 = vmand %vm2525_vm15, %vm2435_vm10  ;;  %v1955_v31 = vpack.c.bf16 %v241_v36, %v240_v16  ;;  %v1134_v44 = vsel %vm2502_vm9, %v2353_v20, 0.0 }
 0x14c   :  { %1759 = vmatmul.mubr.msk.f32.gmra.mrb[10].mxu0 %vm139_vm0, %v297_v50  ;;  %1787 = vmatmul.mubr.msk.f32.gmra.mrb[2].mxu1 %vm139_vm0, %v675_v60  ;;  %v1021_v42 = vsel %vm1009_vm11, %v1001_v40, 0.0  ;;  %v1124_v45 = vsel %vm298_vm2, %v304_v10, 0.0  ;;  %vm1241_vm8 = vmand %vm2502_vm9, %vm2238_vm5  ;;  %v1252_v20 = vsel %vm2232_vm4, %v2284_v49, 0.0  ;;  %v1254_v24 = vsel %vm2308_vm14, %v2384_v18, 0.0 }
 0x14d   :  { %1930 = vmatpush3.bf16.msra.mxu1 %v1927_v46  ;;  %1797 = vmatprep.mubr.msk.f32.mxu1 %vm139_vm0, %v2255_v32  ;;  %v234_v32 = vld [vmem:[%s2692_s2 + $0xd0] sm:$0xff]  ;;  %v1253_v10 = vsel %vm1241_vm8, %v2356_v21, 0.0  ;;  %vm1243_vm2 = vmand %vm2525_vm15, %vm2324_vm7  ;;  %vm1394_vm5 = vcmask 392192   ;;  %vm1564_vm1 = vcmask 519168  }
 0x14e   :  { %1932 = vmatprep.subr.bf16.mxu1 %v1931_v58 }
 0x150   :  { %1798 = vmatmul.mubr.msk.f32.vlgmr.msra.gmra.mrb[0].mxu1 %vm139_vm0, %v2257_v33  ;;  %v895_v33 = vsel %vm2232_vm4, %v877_v43, 0.0  ;;  %v243_v43 = vld [vmem:[%s2692_s2 + $0x118] sm:$0xff]  ;;  %vm1357_vm4 = vcmask 523264   ;;  %s2009_s2 = smov 96  }
 0x151   :  { %1934 = vmatpush3.bf16.msra.mxu1 %v1931_v58  ;;  %1800 = vmatprep.mubr.msk.f32.mxu1 %vm139_vm0, %v2331_v2  ;;  %v1943_v2 = vpack.c.bf16 %v235_v4, %v234_v32  ;;  %v1959_v41 = vpack.c.bf16 %v243_v43, %v242_v30 }
 0x152   :  { %1936 = vmatprep.subr.bf16.mxu1 %v1935_v0 }
 0x154   :  { %1801 = vmatmul.mubr.msk.f32.gmra.mrb[2].mxu1 %vm139_vm0, %v2333_v3 }
 0x155   :  { %1938 = vmatpush3.bf16.msra.mxu1 %v1935_v0  ;;  %1811 = vmatprep.mubr.msk.f32.mxu1 %vm139_vm0, %v895_v33 }
 0x156   :  { %1940 = vmatprep.subr.bf16.mxu1 %v1939_v9 }
 0x158   :  { %1812 = vmatmul.mubr.msk.f32.vlgmr.msra.gmra.mrb[0].mxu1 %vm139_vm0, %v896_v8 }
 0x159   :  { %1942 = vmatpush3.bf16.msra.mxu1 %v1939_v9  ;;  %1814 = vmatprep.mubr.msk.f32.mxu1 %vm139_vm0, %v897_v11 }
 0x15a   :  { %1944 = vmatprep.subr.bf16.mxu1 %v1943_v2 }
 0x15c   :  { %1815 = vmatmul.mubr.msk.f32.gmra.mrb[2].mxu1 %vm139_vm0, %v898_v29 }
 0x15d   :  { %1946 = vmatpush3.bf16.msra.mxu1 %v1943_v2  ;;  %1825 = vmatprep.mubr.msk.f32.mxu1 %vm139_vm0, %v1018_v22 }
 0x15e   :  { %1948 = vmatprep.subr.bf16.mxu1 %v1947_v27 }
 0x160   :  { %1826 = vmatmul.mubr.msk.f32.vlgmr.msra.gmra.mrb[0].mxu1 %vm139_vm0, %v1019_v14 }
 0x161   :  { %1950 = vmatpush3.bf16.msra.mxu1 %v1947_v27  ;;  %1828 = vmatprep.mubr.msk.f32.mxu1 %vm139_vm0, %v1020_v59  ;;  %v2620_v59 = vsub.s32 0, %v2213_v6 }
 0x162   :  { %1952 = vmatprep.subr.bf16.mxu1 %v1951_v39 }
 0x164   :  { %1829 = vmatmul.mubr.msk.f32.gmra.mrb[2].mxu1 %vm139_vm0, %v1021_v42 }
 0x165   :  { %1954 = vmatpush3.bf16.msra.mxu1 %v1951_v39  ;;  %1839 = vmatprep.mubr.msk.f32.mxu1 %vm139_vm0, %v2281_v48  ;;  %v1136_v48 = vsel %vm2525_vm15, %v1124_v45, 0.0 }
 0x166   :  { %1956 = vmatprep.subr.bf16.mxu1 %v1955_v31 }
 0x168   :  { %1840 = vmatmul.mubr.msk.f32.vlgmr.msra.gmra.mrb[0].mxu1 %vm139_vm0, %v1134_v44 }
 0x169   :  { %1958 = vmatpush3.bf16.msra.mxu1 %v1955_v31  ;;  %1842 = vmatprep.mubr.msk.f32.mxu1 %vm139_vm0, %v2361_v25  ;;  %v1239_v25 = vsel %vm517_vm3, %v523_v12, 0.0  ;;  %vm1391_vm3 = vcmask 130048  }
 0x16a   :  { %1960 = vmatprep.subr.bf16.mxu1 %v1959_v41  ;;  %v1255_v23 = vsel %vm1243_vm2, %v1239_v25, 0.0 }
 0x16c   :  { %1843 = vmatmul.mubr.msk.f32.gmra.mrb[2].mxu1 %vm139_vm0, %v1136_v48 }
 0x16d   :  { %1962 = vmatpush3.bf16.msra.mxu1 %v1959_v41  ;;  %1853 = vmatprep.mubr.msk.f32.mxu1 %vm139_vm0, %v1252_v20 }
 0x170   :  { %1854 = vmatmul.mubr.msk.f32.vlgmr.msra.gmra.mrb[0].mxu1 %vm139_vm0, %v1253_v10 }
 0x171   :  { %1856 = vmatprep.mubr.msk.f32.mxu1 %vm139_vm0, %v1254_v24 }
 0x174   :  { %1857 = vmatmul.mubr.msk.f32.gmra.mrb[2].mxu1 %vm139_vm0, %v1255_v23 }
 0x21b   :  { %v1757_v49 = vpop.f32.mrb[8].mxu0 }
 0x21c   :  { %v498_v21 = vpop.f32.mrb[9].mxu0 }
 0x21f   :  { %v1760_v46 = vpop.f32.mrb[10].mxu0 }
 0x220   :  { %v508_v34 = vpop.f32.mrb[11].mxu0 }
 0x243   :  { %v1855_v51 = vpop.f32.mrb[0].mxu1 }
 0x244   :  { %v2591_v18 = vadd.f32 %v1855_v51, %v1757_v49  ;;  %v1334_v3 = vpop.f32.mrb[1].mxu1 }
 0x245   :  { %v2593_v12 = vadd.f32 %v1334_v3, %v498_v21 }
 0x246   :  { %v1359_v63 = vsel %vm1357_vm4, %v2591_v18, 0.0 }
 0x247   :  { %v1358_v47 = vsel %vm1357_vm4, %v2593_v12, 0.0  ;;  %v1858_v52 = vpop.f32.mrb[2].mxu1 }
 0x248   :  { %v1360_v53 = vadd.f32 %v1359_v63, %v1358_v47  ;;  %v2599_v54 = vadd.f32 %v1858_v52, %v1760_v46  ;;  %v1344_v55 = vpop.f32.mrb[3].mxu1 }
 0x249   :  { %v2601_v56 = vadd.f32 %v1344_v55, %v508_v34 }
 0x24a   :  { %v1361_v57 = vrot.slane %v1360_v53, 4  ;;  %v1455_v35 = vsel %vm1357_vm4, %v2599_v54, 0.0 }
 0x24b   :  { %v1454_v50 = vsel %vm1357_vm4, %v2601_v56, 0.0 }
 0x24c   :  { %v1362_v58 = vadd.f32 %v1361_v57, %v1360_v53  ;;  %v1456_v60 = vadd.f32 %v1455_v35, %v1454_v50 }
 0x24e   :  { %v1363_v61 = vrot.slane %v1362_v58, 2  ;;  %v1457_v62 = vrot.slane %v1456_v60, 4 }
 0x250   :  { %v1364_v0 = vadd.f32 %v1363_v61, %v1362_v58  ;;  %v1458_v1 = vadd.f32 %v1457_v62, %v1456_v60 }
 0x252   :  { %v1459_v7 = vrot.slane %v1458_v1, 2  ;;  %v1365_v9 = vrot.slane %v1364_v0, 1 }
 0x254   :  { %v1460_v32 = vadd.f32 %v1459_v7, %v1458_v1  ;;  %v1366_v4 = vadd.f32 %v1365_v9, %v1364_v0 }
 0x256   :  { %1372 = vrot.lane.b32.xlu1 %v1366_v4, %s2009_s2  ;;  %1368 = vrot.lane.b32.xlu0 %v1366_v4, %s2010_s23  ;;  %v1461_v33 = vrot.slane %v1460_v32, 1 }
 0x258   :  { %v1462_v5 = vadd.f32 %v1461_v33, %v1460_v32 }
 0x25a   :  { %1468 = vrot.lane.b32.xlu1 %v1462_v5, %s2009_s2  ;;  %1464 = vrot.lane.b32.xlu0 %v1462_v5, %s2010_s23 }
 0x25e   :  { %1472 = vrot.lane.b32.xlu1 %v1462_v5, %s2011_s24  ;;  %1376 = vrot.lane.b32.xlu0 %v1366_v4, %s2011_s24 }
 0x2c8   :  { %v1373_v2 = vpop.permute.xlu1 %1372  ;;  %v1369_v8 = vpop.permute.xlu0 %1368 }
 0x2c9   :  { %v1371_v13 = vadd.f32 %v1369_v8, %v1366_v4 }
 0x2cb   :  { %v1375_v19 = vadd.f32 %v1373_v2, %v1371_v13 }
 0x2cc   :  { %v1469_v15 = vpop.permute.xlu1 %1468  ;;  %v1465_v11 = vpop.permute.xlu0 %1464 }
 0x2cd   :  { %v1467_v17 = vadd.f32 %v1465_v11, %v1462_v5 }
 0x2cf   :  { %v1471_v26 = vadd.f32 %v1469_v15, %v1467_v17 }
 0x2d0   :  { %v1473_v27 = vpop.permute.xlu1 %1472  ;;  %v1377_v29 = vpop.permute.xlu0 %1376 }
 0x2d1   :  { %v1475_v28 = vadd.f32 %v1473_v27, %v1471_v26  ;;  %v1379_v37 = vadd.f32 %v1377_v29, %v1375_v19 }
 0x2d3   :  { %v1476_v22 = vmul.f32 0.015625, %v1475_v28  ;;  %v1380_v38 = vmul.f32 0.015625, %v1379_v37 }
 0x2d5   :  { %1478 = vrot.lane.b32.xlu1 %v1476_v22, %s2012_s25  ;;  %1382 = vrot.lane.b32.xlu0 %v1380_v38, %s2012_s25 }
 0x2d9   :  { %1481 = vrot.lane.b32.xlu1 %v1476_v22, %s2013_s26  ;;  %1385 = vrot.lane.b32.xlu0 %v1380_v38, %s2013_s26 }
 0x2dd   :  { %1484 = vrot.lane.b32.xlu1 %v1476_v22, %s2014_s27  ;;  %1388 = vrot.lane.b32.xlu0 %v1380_v38, %s2014_s27 }
 0x347   :  { %v1479_v39 = vpop.permute.xlu1 %1478  ;;  %v1383_v14 = vpop.permute.xlu0 %1382 }
 0x348   :  { %v1487_v40 = vsel %vm1391_vm3, %v1476_v22, %v1479_v39  ;;  %v1392_v31 = vsel %vm1391_vm3, %v1380_v38, %v1383_v14 }
 0x34b   :  { %v1482_v16 = vpop.permute.xlu1 %1481  ;;  %v1386_v36 = vpop.permute.xlu0 %1385 }
 0x34c   :  { %v1488_v42 = vsel %vm139_vm0, %v1487_v40, %v1482_v16  ;;  %v1393_v30 = vsel %vm139_vm0, %v1392_v31, %v1386_v36 }
 0x34f   :  { %v1485_v43 = vpop.permute.xlu1 %1484  ;;  %v1389_v41 = vpop.permute.xlu0 %1388 }
 0x350   :  { %v1489_v44 = vsel %vm1394_vm5, %v1488_v42, %v1485_v43  ;;  %v1395_v45 = vsel %vm1394_vm5, %v1393_v30, %v1389_v41 }
 0x351   :  { %v1493_v48 = vrot.slane %v1489_v44, %v2620_v59  ;;  %v1399_v20 = vrot.slane %v1395_v45, %v2620_v59 }
 0x353   :  { %v2631_v6 = vsub.f32 %v2601_v56, %v1493_v48  ;;  %v2634_v10 = vsub.f32 %v2599_v54, %v1493_v48  ;;  %v2637_v24 = vsub.f32 %v2593_v12, %v1399_v20  ;;  %v2640_v25 = vsub.f32 %v2591_v18, %v1399_v20 }
 0x355   :  { %v1496_v23 = vmul.f32 %v2631_v6, %v2631_v6  ;;  %v1497_v49 = vmul.f32 %v2634_v10, %v2634_v10  ;;  %v1402_v21 = vmul.f32 %v2637_v24, %v2637_v24  ;;  %v1403_v46 = vmul.f32 %v2640_v25, %v2640_v25 }
 0x357   :  { %v1498_v34 = vsel %vm1357_vm4, %v1496_v23, 0.0  ;;  %v1499_v51 = vsel %vm1357_vm4, %v1497_v49, 0.0  ;;  %v1404_v3 = vsel %vm1357_vm4, %v1402_v21, 0.0  ;;  %v1405_v18 = vsel %vm1357_vm4, %v1403_v46, 0.0 }
 0x358   :  { %v1500_v12 = vadd.f32 %v1499_v51, %v1498_v34  ;;  %v1406_v63 = vadd.f32 %v1405_v18, %v1404_v3 }
 0x35a   :  { %v1501_v47 = vrot.slane %v1500_v12, 4  ;;  %v1407_v52 = vrot.slane %v1406_v63, 4 }
 0x35c   :  { %v1502_v53 = vadd.f32 %v1501_v47, %v1500_v12  ;;  %v1408_v54 = vadd.f32 %v1407_v52, %v1406_v63 }
 0x35e   :  { %v1503_v55 = vrot.slane %v1502_v53, 2  ;;  %v1409_v56 = vrot.slane %v1408_v54, 2 }
 0x360   :  { %v1504_v57 = vadd.f32 %v1503_v55, %v1502_v53  ;;  %v1410_v35 = vadd.f32 %v1409_v56, %v1408_v54 }
 0x362   :  { %v1505_v50 = vrot.slane %v1504_v57, 1  ;;  %v1411_v58 = vrot.slane %v1410_v35, 1 }
 0x364   :  { %v1506_v60 = vadd.f32 %v1505_v50, %v1504_v57  ;;  %v1412_v61 = vadd.f32 %v1411_v58, %v1410_v35 }
 0x366   :  { %1508 = vrot.lane.b32.xlu1 %v1506_v60, %s2010_s23  ;;  %1414 = vrot.lane.b32.xlu0 %v1412_v61, %s2010_s23 }
 0x36a   :  { %1512 = vrot.lane.b32.xlu1 %v1506_v60, %s2009_s2  ;;  %1418 = vrot.lane.b32.xlu0 %v1412_v61, %s2009_s2 }
 0x36e   :  { %1516 = vrot.lane.b32.xlu1 %v1506_v60, %s2011_s24  ;;  %1422 = vrot.lane.b32.xlu0 %v1412_v61, %s2011_s24 }
 0x3d8   :  { %v1509_v62 = vpop.permute.xlu1 %1508  ;;  %v1415_v0 = vpop.permute.xlu0 %1414 }
 0x3d9   :  { %v1511_v9 = vadd.f32 %v1509_v62, %v1506_v60  ;;  %v1417_v32 = vadd.f32 %v1415_v0, %v1412_v61 }
 0x3dc   :  { %v1513_v1 = vpop.permute.xlu1 %1512  ;;  %v1419_v7 = vpop.permute.xlu0 %1418 }
 0x3dd   :  { %v1515_v4 = vadd.f32 %v1513_v1, %v1511_v9  ;;  %v1421_v33 = vadd.f32 %v1419_v7, %v1417_v32 }
 0x3e0   :  { %v1517_v5 = vpop.permute.xlu1 %1516  ;;  %v1423_v2 = vpop.permute.xlu0 %1422 }
 0x3e1   :  { %v1519_v8 = vadd.f32 %v1517_v5, %v1515_v4  ;;  %v1425_v13 = vadd.f32 %v1423_v2, %v1421_v33 }
 0x3e3   :  { %v1520_v15 = vmul.f32 0.015625, %v1519_v8  ;;  %v1426_v11 = vmul.f32 0.015625, %v1425_v13 }
 0x3e5   :  { %v1521_v17 = vadd.f32 1e-08, %v1520_v15  ;;  %v1427_v26 = vadd.f32 1e-08, %v1426_v11 }
 0x3e7   :  { %2005 = vrsqrt.f32 %v1521_v17 }
 0x3e8   :  { %2007 = vrsqrt.f32 %v1427_v26 }
 0x3f1   :  { %v2006_v19 = vpop.eup %2005 }
 0x3f2   :  { %v2008_v27 = vpop.eup %2007  ;;  %1524 = vrot.lane.b32.xlu1 %v2006_v19, %s2012_s25 }
 0x3f3   :  { %1430 = vrot.lane.b32.xlu0 %v2008_v27, %s2012_s25 }
 0x3f6   :  { %1527 = vrot.lane.b32.xlu1 %v2006_v19, %s2013_s26 }
 0x3f7   :  { %1433 = vrot.lane.b32.xlu0 %v2008_v27, %s2013_s26 }
 0x3fa   :  { %1530 = vrot.lane.b32.xlu1 %v2006_v19, %s2014_s27 }
 0x3fb   :  { %1436 = vrot.lane.b32.xlu0 %v2008_v27, %s2014_s27 }
 0x464   :  { %v1525_v29 = vpop.permute.xlu1 %1524 }
 0x465   :  { %v1431_v28 = vpop.permute.xlu0 %1430  ;;  %v1533_v38 = vsel %vm1391_vm3, %v2006_v19, %v1525_v29 }
 0x466   :  { %v1439_v39 = vsel %vm1391_vm3, %v2008_v27, %v1431_v28 }
 0x468   :  { %v1528_v37 = vpop.permute.xlu1 %1527 }
 0x469   :  { %v1434_v22 = vpop.permute.xlu0 %1433  ;;  %v1534_v14 = vsel %vm139_vm0, %v1533_v38, %v1528_v37 }
 0x46a   :  { %v1440_v36 = vsel %vm139_vm0, %v1439_v39, %v1434_v22 }
 0x46c   :  { %v1531_v16 = vpop.permute.xlu1 %1530 }
 0x46d   :  { %v1535_v40 = vsel %vm1394_vm5, %v1534_v14, %v1531_v16  ;;  %v1437_v31 = vpop.permute.xlu0 %1436 }
 0x46e   :  { %v1539_v42 = vrot.slane %v1535_v40, %v2620_v59  ;;  %v1441_v30 = vsel %vm1394_vm5, %v1440_v36, %v1437_v31 }
 0x46f   :  { %v1445_v43 = vrot.slane %v1441_v30, %v2620_v59 }
 0x470   :  { %v1540_v41 = vmul.f32 %v1539_v42, %v2631_v6  ;;  %v1541_v44 = vmul.f32 %v1539_v42, %v2634_v10 }
 0x471   :  { %v1446_v45 = vmul.f32 %v1445_v43, %v2637_v24  ;;  %v1447_v48 = vmul.f32 %v1445_v43, %v2640_v25 }
 0x472   :  { %vm1542_vm14 = vcmp.gt.f32.partialorder %v1540_v41, 0.0  ;;  %vm1543_vm7 = vcmp.gt.f32.partialorder %v1541_v44, 0.0  ;;  %v1544_v20 = vmul.f32 0.2, %v1540_v41  ;;  %v1545_v23 = vmul.f32 0.2, %v1541_v44 }
 0x473   :  { %vm1448_vm0 = vcmp.gt.f32.partialorder %v1446_v45, 0.0  ;;  %vm1449_vm6 = vcmp.gt.f32.partialorder %v1447_v48, 0.0  ;;  %v1450_v49 = vmul.f32 0.2, %v1446_v45  ;;  %v1451_v21 = vmul.f32 0.2, %v1447_v48 }
 0x474   :  { %v1546_v46 = vsel %vm1542_vm14, %v1540_v41, %v1544_v20  ;;  %v1547_v34 = vsel %vm1543_vm7, %v1541_v44, %v1545_v23 }
 0x475   :  { %v1615_v59 = vpack.c.bf16 %v1546_v46, %v1546_v46  ;;  %v1616_v51 = vpack.c.bf16 %v1547_v34, %v1547_v34  ;;  %v1452_v6 = vsel %vm1448_vm0, %v1446_v45, %v1450_v49  ;;  %v1453_v3 = vsel %vm1449_vm6, %v1447_v48, %v1451_v21 }
 0x476   :  { %v1613_v10 = vpack.c.bf16 %v1452_v6, %v1452_v6  ;;  %v1614_v18 = vpack.c.bf16 %v1453_v3, %v1453_v3 }
 0x477   :  { %1567 = vst.msk [vmem:[%s2693_s3 + $0x8] sm:$0xf] %vm1564_vm1, %v1615_v59  ;;  %1568 = vst.msk [vmem:[%s2693_s3 + $0xc] sm:$0xf] %vm1564_vm1, %v1616_v51 }
 0x478   :  { %1565 = vst.msk [vmem:[%s2693_s3] sm:$0xf] %vm1564_vm1, %v1613_v10  ;;  %1566 = vst.msk [vmem:[%s2693_s3 + $0x4] sm:$0xf] %vm1564_vm1, %v1614_v18 }

</bundles_post_ra>
